<compile_context>
chip_gen: v7x
topology: tpu7x:2x2x1
jax: 0.10.0
libtpu: 0.0.40
codegen_flags: <defaults>
</compile_context>

<pallas_src>
import functools

import jax
import jax.numpy as jnp
from jax.experimental import pallas as pl
from jax.experimental.pallas import tpu as pltpu


def _round_up(x, m):
    return (x + m - 1) // m * m


# ---------------------------------------------------------------------------
# Kernel: fused 3-backbone conv -> ReLU -> masked-sum pool -> folded heads+FC
# ---------------------------------------------------------------------------
def _ensemble_kernel(
    x_ref,        # (RB_EXT, C)   bf16  flattened zero-padded row band of the image
    mask_ref,     # (ROWS, 1)     f32   1.0 for real output pixels, 0.0 for pad cols
    wc_ref,       # (9, C, NPAD)  bf16  fused conv taps (branch1|branch2|branch3, 0-pad)
    bc_ref,       # (1, NPAD)     f32   fused conv bias
    wcombo_ref,   # (NPAD, CPAD)  f32   folded (head_i @ finalFc) / (H*W)
    bcombo_ref,   # (1, CPAD)     f32   folded bias
    out_ref,      # (1, CPAD)     f32   lane-dense logits slab for this batch element
    pooled_acc,   # (1, NPAD)     f32   scratch: running sum of relu(conv)
    *, wp, rows_out,
):
    t = pl.program_id(1)

    @pl.when(t == 0)
    def _init():
        pooled_acc[...] = jnp.zeros_like(pooled_acc)

    # Load the band once; upcast so the 9 statically shifted row slices below
    # are plain f32 relayouts (values are bf16-exact, so the math is unchanged).
    xf = x_ref[...].astype(jnp.float32)

    # 3x3 SAME conv of all three backbones at once: flattening the padded band
    # turns every tap (dh, dw) into a constant row offset, so im2col never
    # materializes in HBM.  9 small MXU dots accumulated in f32.
    acc = None
    for dh in range(3):
        for dw in range(3):
            off = dh * wp + dw
            xs = xf[off:off + rows_out, :].astype(jnp.bfloat16)       # (ROWS, C)
            part = jnp.dot(xs, wc_ref[dh * 3 + dw],
                           preferred_element_type=jnp.float32)        # (ROWS, NPAD)
            acc = part if acc is None else acc + part

    h = jnp.maximum(acc + bc_ref[...], 0.0)                           # bias + ReLU

    # Global-average-pool accumulation (sum now; 1/(H*W) is folded into wcombo).
    # The mask zeroes flat rows that correspond to the right zero-pad columns.
    pooled_acc[...] += jnp.sum(h * mask_ref[...], axis=0, keepdims=True)

    @pl.when(t == pl.num_programs(1) - 1)
    def _finalize():
        logits = jnp.dot(pooled_acc[...], wcombo_ref[...],
                         preferred_element_type=jnp.float32)          # (1, CPAD)
        out_ref[...] = (logits + bcombo_ref[...]).astype(out_ref.dtype)


# ---------------------------------------------------------------------------
# Host-side wrapper
# ---------------------------------------------------------------------------
def ensemble_forward(x, packed, *, num_classes, row_tile=8):
    """x: (B, C, H, W) float32 NCHW.  Returns (B, num_classes) float32 logits."""
    b, c, h, w = x.shape
    th = row_tile if (h % row_tile == 0) else h       # output rows per grid step
    nt = h // th
    wp = w + 2                                        # padded width
    rows_out = th * wp                                # flat conv rows per step
    rb = (th + 2) * wp                                # flat rows a band really holds
    rb_ext = _round_up(rb + 2, 8)                     # slack so every tap offset is in-bounds

    npad = packed["bc"].shape[-1]
    cpad = packed["bcombo"].shape[-1]

    # NCHW -> NHWC, bf16, SAME zero-pad, slice into row bands overlapping by the
    # 3x3 halo (2 rows), flatten each band's spatial grid.  Traffic overhead is
    # only the 2-row halo per band (vs. 9x for host im2col).
    xq = jnp.transpose(x.astype(jnp.bfloat16), (0, 2, 3, 1))
    xp = jnp.pad(xq, ((0, 0), (1, 1), (1, 1), (0, 0)))
    bands = jnp.stack([xp[:, t * th: t * th + th + 2] for t in range(nt)], axis=1)
    bands = bands.reshape(b, nt, rb, c)
    bands = jnp.pad(bands, ((0, 0), (0, 0), (0, rb_ext - rb), (0, 0)))

    # Valid-output mask: flat row r is a real pixel iff (r % wp) < w.
    mask = ((jnp.arange(rows_out) % wp) < w).astype(jnp.float32).reshape(rows_out, 1)

    kernel = functools.partial(_ensemble_kernel, wp=wp, rows_out=rows_out)

    flops = 2 * b * h * w * 9 * c * npad + 2 * b * npad * cpad
    bytes_accessed = (bands.size * 2 + mask.size * 4 + packed["wc"].size * 2
                      + packed["bc"].size * 4 + packed["wcombo"].size * 4
                      + packed["bcombo"].size * 4 + b * cpad * 4)

    out_padded = pl.pallas_call(
        kernel,
        out_shape=jax.ShapeDtypeStruct((b, 1, cpad), jnp.float32),
        grid_spec=pltpu.PrefetchScalarGridSpec(
            num_scalar_prefetch=0,
            grid=(b, nt),
            in_specs=[
                pl.BlockSpec((pl.Squeezed(), pl.Squeezed(), rb_ext, c),
                             lambda bb, t: (bb, t, 0, 0)),
                pl.BlockSpec((rows_out, 1), lambda bb, t: (0, 0)),
                pl.BlockSpec((9, c, npad), lambda bb, t: (0, 0, 0)),
                pl.BlockSpec((1, npad), lambda bb, t: (0, 0)),
                pl.BlockSpec((npad, cpad), lambda bb, t: (0, 0)),
                pl.BlockSpec((1, cpad), lambda bb, t: (0, 0)),
            ],
            out_specs=pl.BlockSpec((pl.Squeezed(), 1, cpad),
                                   lambda bb, t: (bb, 0, 0)),
            scratch_shapes=[pltpu.VMEM((1, npad), jnp.float32)],
        ),
        compiler_params=pltpu.CompilerParams(
            dimension_semantics=("parallel", "arbitrary"),
            vmem_limit_bytes=32 * 1024 * 1024,
        ),
        cost_estimate=pl.CostEstimate(
            flops=flops, transcendentals=0, bytes_accessed=bytes_accessed),
    )(bands, mask, packed["wc"], packed["bc"], packed["wcombo"], packed["bcombo"])

    # Strip the lane-dense padding (CPAD=128 -> num_classes).
    return out_padded[:, 0, :num_classes]


# ---------------------------------------------------------------------------
# Frozen-weight folding / packing (done once on the host)
# ---------------------------------------------------------------------------
def pack_params(raw, *, cin, hw, num_classes, lane=128):
    hi = jax.lax.Precision.HIGHEST
    couts = [raw[f"conv_w{i}"].shape[0] for i in (1, 2, 3)]
    total = sum(couts)
    npad = _round_up(total, lane)          # 48+64+40 = 152 -> 256
    cpad = _round_up(num_classes, lane)    # 3 -> 128 (lane-dense logits slab)

    wf_t = raw["fc_w"].T                   # (F, num_classes)

    wc_taps, bcs, wcombos = [], [], []
    bcombo = raw["fc_b"]
    for i in (1, 2, 3):
        cw = raw[f"conv_w{i}"]                                       # (cout, cin, 3, 3)
        wc_taps.append(jnp.transpose(cw, (2, 3, 1, 0)).reshape(9, cin, -1))
        bcs.append(raw[f"conv_b{i}"])
        # pooled_mean_i @ Wh_i^T @ Wf^T  ==  pooled_sum_i @ (Wh_i^T Wf^T) / (H*W)
        wcombos.append(jnp.dot(raw[f"head_w{i}"].T, wf_t, precision=hi) / float(hw))
        bcombo = bcombo + jnp.dot(raw[f"head_b{i}"], wf_t, precision=hi)

    wc = jnp.pad(jnp.concatenate(wc_taps, axis=-1),
                 ((0, 0), (0, 0), (0, npad - total)))
    bc = jnp.pad(jnp.concatenate(bcs), (0, npad - total)).reshape(1, npad)
    wcombo = jnp.pad(jnp.concatenate(wcombos, axis=0),
                     ((0, npad - total), (0, cpad - num_classes)))
    bcombo = jnp.pad(bcombo, (0, cpad - num_classes)).reshape(1, cpad)

    return {
        "wc": wc.astype(jnp.bfloat16),         # big conv-path weight -> bf16
        "bc": bc.astype(jnp.float32),
        "wcombo": wcombo.astype(jnp.float32),  # tiny (256x128); keep f32
        "bcombo": bcombo.astype(jnp.float32),
    }


# ---------------------------------------------------------------------------
# Pure-JAX branch-by-branch reference (un-fused, un-folded), HIGHEST precision,
# using the same bf16 rounding of x and conv weights as the kernel.
# ---------------------------------------------------------------------------
def ensemble_reference(x, raw, num_classes):
    b, c, h, w = x.shape
    hi = jax.lax.Precision.HIGHEST
    xq = x.astype(jnp.bfloat16).astype(jnp.float32)
    xp = jnp.pad(jnp.transpose(xq, (0, 2, 3, 1)), ((0, 0), (1, 1), (1, 1), (0, 0)))

    def branch(cw, cb, hw_w, hb):
        cwq = cw.astype(jnp.bfloat16).astype(jnp.float32)            # (cout, cin, 3, 3)
        acc = jnp.zeros((b, h, w, cw.shape[0]), jnp.float32)
        for dh in range(3):
            for dw in range(3):
                acc = acc + jnp.einsum("bijc,oc->bijo",
                                       xp[:, dh:dh + h, dw:dw + w, :],
                                       cwq[:, :, dh, dw], precision=hi)
        act = jnp.maximum(acc + cb, 0.0)
        pooled = act.mean(axis=(1, 2))                               # (b, cout)
        return jnp.dot(pooled, hw_w.T, precision=hi) + hb            # (b, F)

    out = (branch(raw["conv_w1"], raw["conv_b1"], raw["head_w1"], raw["head_b1"])
           + branch(raw["conv_w2"], raw["conv_b2"], raw["head_w2"], raw["head_b2"])
           + branch(raw["conv_w3"], raw["conv_b3"], raw["head_w3"], raw["head_b3"]))
    return jnp.dot(out, raw["fc_w"].T, precision=hi) + raw["fc_b"]


def init_raw_params(key, cin, feature_dims, num_classes, couts):
    """PyTorch-layout parameters for the three stand-in backbones + finalFc."""
    keys = iter(jax.random.split(key, 4 * len(couts) + 2))
    p = {}
    for i, cout in enumerate(couts, start=1):
        p[f"conv_w{i}"] = (jax.random.normal(next(keys), (cout, cin, 3, 3), jnp.float32)
                           / jnp.sqrt(9.0 * cin))
        p[f"conv_b{i}"] = 0.01 * jax.random.normal(next(keys), (cout,), jnp.float32)
        p[f"head_w{i}"] = (jax.random.normal(next(keys), (feature_dims, cout), jnp.float32)
                           / jnp.sqrt(1.0 * cout))
        p[f"head_b{i}"] = 0.01 * jax.random.normal(next(keys), (feature_dims,), jnp.float32)
    p["fc_w"] = (jax.random.normal(next(keys), (num_classes, feature_dims), jnp.float32)
                 / jnp.sqrt(1.0 * feature_dims))
    p["fc_b"] = 0.01 * jax.random.normal(next(keys), (num_classes,), jnp.float32)
    return p


if __name__ == "__main__":
    B, C, H, W = 2, 4, 16, 16
    COUTS = (48, 64, 40)                    # stand-in model{1,2,3} classifier in_features
    FEATURE_DIMS = min(min(COUTS), 512)     # module: feature_dims = min(in_feats..., 512)
    NUM_CLASSES = 3

    key = jax.random.PRNGKey(0)
    kx, kp = jax.random.split(key)
    x = jax.random.normal(kx, (B, C, H, W), jnp.float32)

    raw = init_raw_params(kp, C, FEATURE_DIMS, NUM_CLASSES, COUTS)
    packed = pack_params(raw, cin=C, hw=H * W, num_classes=NUM_CLASSES)

    fwd = jax.jit(functools.partial(ensemble_forward,
                                    num_classes=NUM_CLASSES, row_tile=8))
    out = jax.block_until_ready(fwd(x, packed))

    ref = ensemble_reference(x, raw, NUM_CLASSES)
    assert out.shape == (B, NUM_CLASSES), out.shape
    # Tolerance budgets for bf16 rounding of x / conv weights and f32
    # accumulation-order differences; structural bugs are orders larger.
    assert jnp.allclose(out, ref, atol=1e-2, rtol=1e-2), (out, ref)

    print("KERNEL_OK")
</pallas_src>

<mosaic_0001>
module attributes {stable_mosaic.version = 11 : i64} {
  func.func @_ensemble_kernel(%arg0: i32, %arg1: i32, %arg2: memref<1x1x184x4xbf16, #tpu.memory_space<vmem>>, %arg3: memref<144x1xf32, #tpu.memory_space<vmem>>, %arg4: memref<9x4x256xbf16, #tpu.memory_space<vmem>>, %arg5: memref<1x256xf32, #tpu.memory_space<vmem>>, %arg6: memref<256x128xf32, #tpu.memory_space<vmem>>, %arg7: memref<1x128xf32, #tpu.memory_space<vmem>>, %arg8: memref<1x1x128xf32, #tpu.memory_space<vmem>>, %arg9: memref<1x256xf32, #tpu.memory_space<vmem>>) attributes {dimension_semantics = [#tpu.dimension_semantics<parallel>, #tpu.dimension_semantics<arbitrary>], iteration_bounds = array<i64: 2, 2>, scalar_prefetch = 0 : i64, scratch_operands = 1 : i64, tpu.core_type = #tpu.core_type<tc>, window_params = [{transform_indices = @transform_0, window_bounds = array<i64: 1, 1, 184, 4>}, {pipeline_mode = #tpu.pipeline_mode<synchronous>, transform_indices = @transform_1, window_bounds = array<i64: 144, 1>}, {pipeline_mode = #tpu.pipeline_mode<synchronous>, transform_indices = @transform_2, window_bounds = array<i64: 9, 4, 256>}, {pipeline_mode = #tpu.pipeline_mode<synchronous>, transform_indices = @transform_3, window_bounds = array<i64: 1, 256>}, {pipeline_mode = #tpu.pipeline_mode<synchronous>, transform_indices = @transform_4, window_bounds = array<i64: 256, 128>}, {pipeline_mode = #tpu.pipeline_mode<synchronous>, transform_indices = @transform_5, window_bounds = array<i64: 1, 128>}, {transform_indices = @transform_6, window_bounds = array<i64: 1, 1, 128>}]} {
    %c0_i32 = arith.constant 0 : i32
    %0 = arith.cmpi eq, %arg1, %c0_i32 : i32
    %1 = arith.extui %0 : i1 to i32
    %c0_i32_0 = arith.constant 0 : i32
    %2 = arith.cmpi ne, %1, %c0_i32_0 : i32
    scf.if %2 {
      %cst_42 = arith.constant 0.000000e+00 : f32
      %75 = vector.broadcast %cst_42 : f32 to vector<1x256xf32>
      %c0_43 = arith.constant 0 : index
      %c0_44 = arith.constant 0 : index
      %76 = vector.load %arg9[%c0_43, %c0_44] : memref<1x256xf32, #tpu.memory_space<vmem>>, vector<1x256xf32>
      tpu.vector_store %arg9[%c0_43, %c0_44], %75 {strides = array<i32>} : memref<1x256xf32, #tpu.memory_space<vmem>>, vector<1x256xf32>,
    } else {
    }
    %c0 = arith.constant 0 : index
    %c0_1 = arith.constant 0 : index
    %c0_2 = arith.constant 0 : index
    %c0_3 = arith.constant 0 : index
    %3 = vector.load %arg2[%c0, %c0_1, %c0_2, %c0_3] : memref<1x1x184x4xbf16, #tpu.memory_space<vmem>>, vector<1x1x184x4xbf16>
    %4 = vector.shape_cast %3 : vector<1x1x184x4xbf16> to vector<184x4xbf16>
    %5 = arith.extf %4 : vector<184x4xbf16> to vector<184x4xf32>
    %6 = vector.extract_strided_slice %5 {offsets = [0, 0], sizes = [144, 4], strides = [1, 1]} : vector<184x4xf32> to vector<144x4xf32>
    %7 = arith.truncf %6 : vector<144x4xf32> to vector<144x4xbf16>
    %c0_4 = arith.constant 0 : index
    %c0_5 = arith.constant 0 : index
    %c0_6 = arith.constant 0 : index
    %8 = vector.load %arg4[%c0_4, %c0_5, %c0_6] : memref<9x4x256xbf16, #tpu.memory_space<vmem>>, vector<1x4x256xbf16>
    %9 = vector.shape_cast %8 : vector<1x4x256xbf16> to vector<4x256xbf16>
    %cst = arith.constant dense<0.000000e+00> : vector<144x256xf32>
    %10 = tpu.matmul %7, %9, %cst {dimension_numbers = #tpu.dot_dimension_numbers<[1], [0], [0], [1], [0, 0, 1, 1], [], []>} : vector<144x4xbf16>, vector<4x256xbf16>, vector<144x256xf32> -> vector<144x256xf32>
    %11 = vector.extract_strided_slice %5 {offsets = [1, 0], sizes = [144, 4], strides = [1, 1]} : vector<184x4xf32> to vector<144x4xf32>
    %12 = arith.truncf %11 : vector<144x4xf32> to vector<144x4xbf16>
    %c1 = arith.constant 1 : index
    %c0_7 = arith.constant 0 : index
    %c0_8 = arith.constant 0 : index
    %13 = vector.load %arg4[%c1, %c0_7, %c0_8] : memref<9x4x256xbf16, #tpu.memory_space<vmem>>, vector<1x4x256xbf16>
    %14 = vector.shape_cast %13 : vector<1x4x256xbf16> to vector<4x256xbf16>
    %cst_9 = arith.constant dense<0.000000e+00> : vector<144x256xf32>
    %15 = tpu.matmul %12, %14, %cst_9 {dimension_numbers = #tpu.dot_dimension_numbers<[1], [0], [0], [1], [0, 0, 1, 1], [], []>} : vector<144x4xbf16>, vector<4x256xbf16>, vector<144x256xf32> -> vector<144x256xf32>
    %16 = arith.addf %10, %15 : vector<144x256xf32>
    %17 = vector.extract_strided_slice %5 {offsets = [2, 0], sizes = [144, 4], strides = [1, 1]} : vector<184x4xf32> to vector<144x4xf32>
    %18 = arith.truncf %17 : vector<144x4xf32> to vector<144x4xbf16>
    %c2 = arith.constant 2 : index
    %c0_10 = arith.constant 0 : index
    %c0_11 = arith.constant 0 : index
    %19 = vector.load %arg4[%c2, %c0_10, %c0_11] : memref<9x4x256xbf16, #tpu.memory_space<vmem>>, vector<1x4x256xbf16>
    %20 = vector.shape_cast %19 : vector<1x4x256xbf16> to vector<4x256xbf16>
    %cst_12 = arith.constant dense<0.000000e+00> : vector<144x256xf32>
    %21 = tpu.matmul %18, %20, %cst_12 {dimension_numbers = #tpu.dot_dimension_numbers<[1], [0], [0], [1], [0, 0, 1, 1], [], []>} : vector<144x4xbf16>, vector<4x256xbf16>, vector<144x256xf32> -> vector<144x256xf32>
    %22 = arith.addf %16, %21 : vector<144x256xf32>
    %23 = vector.extract_strided_slice %5 {offsets = [18, 0], sizes = [144, 4], strides = [1, 1]} : vector<184x4xf32> to vector<144x4xf32>
    %24 = arith.truncf %23 : vector<144x4xf32> to vector<144x4xbf16>
    %c3 = arith.constant 3 : index
    %c0_13 = arith.constant 0 : index
    %c0_14 = arith.constant 0 : index
    %25 = vector.load %arg4[%c3, %c0_13, %c0_14] : memref<9x4x256xbf16, #tpu.memory_space<vmem>>, vector<1x4x256xbf16>
    %26 = vector.shape_cast %25 : vector<1x4x256xbf16> to vector<4x256xbf16>
    %cst_15 = arith.constant dense<0.000000e+00> : vector<144x256xf32>
    %27 = tpu.matmul %24, %26, %cst_15 {dimension_numbers = #tpu.dot_dimension_numbers<[1], [0], [0], [1], [0, 0, 1, 1], [], []>} : vector<144x4xbf16>, vector<4x256xbf16>, vector<144x256xf32> -> vector<144x256xf32>
    %28 = arith.addf %22, %27 : vector<144x256xf32>
    %29 = vector.extract_strided_slice %5 {offsets = [19, 0], sizes = [144, 4], strides = [1, 1]} : vector<184x4xf32> to vector<144x4xf32>
    %30 = arith.truncf %29 : vector<144x4xf32> to vector<144x4xbf16>
    %c4 = arith.constant 4 : index
    %c0_16 = arith.constant 0 : index
    %c0_17 = arith.constant 0 : index
    %31 = vector.load %arg4[%c4, %c0_16, %c0_17] : memref<9x4x256xbf16, #tpu.memory_space<vmem>>, vector<1x4x256xbf16>
    %32 = vector.shape_cast %31 : vector<1x4x256xbf16> to vector<4x256xbf16>
    %cst_18 = arith.constant dense<0.000000e+00> : vector<144x256xf32>
    %33 = tpu.matmul %30, %32, %cst_18 {dimension_numbers = #tpu.dot_dimension_numbers<[1], [0], [0], [1], [0, 0, 1, 1], [], []>} : vector<144x4xbf16>, vector<4x256xbf16>, vector<144x256xf32> -> vector<144x256xf32>
    %34 = arith.addf %28, %33 : vector<144x256xf32>
    %35 = vector.extract_strided_slice %5 {offsets = [20, 0], sizes = [144, 4], strides = [1, 1]} : vector<184x4xf32> to vector<144x4xf32>
    %36 = arith.truncf %35 : vector<144x4xf32> to vector<144x4xbf16>
    %c5 = arith.constant 5 : index
    %c0_19 = arith.constant 0 : index
    %c0_20 = arith.constant 0 : index
    %37 = vector.load %arg4[%c5, %c0_19, %c0_20] : memref<9x4x256xbf16, #tpu.memory_space<vmem>>, vector<1x4x256xbf16>
    %38 = vector.shape_cast %37 : vector<1x4x256xbf16> to vector<4x256xbf16>
    %cst_21 = arith.constant dense<0.000000e+00> : vector<144x256xf32>
    %39 = tpu.matmul %36, %38, %cst_21 {dimension_numbers = #tpu.dot_dimension_numbers<[1], [0], [0], [1], [0, 0, 1, 1], [], []>} : vector<144x4xbf16>, vector<4x256xbf16>, vector<144x256xf32> -> vector<144x256xf32>
    %40 = arith.addf %34, %39 : vector<144x256xf32>
    %41 = vector.extract_strided_slice %5 {offsets = [36, 0], sizes = [144, 4], strides = [1, 1]} : vector<184x4xf32> to vector<144x4xf32>
    %42 = arith.truncf %41 : vector<144x4xf32> to vector<144x4xbf16>
    %c6 = arith.constant 6 : index
    %c0_22 = arith.constant 0 : index
    %c0_23 = arith.constant 0 : index
    %43 = vector.load %arg4[%c6, %c0_22, %c0_23] : memref<9x4x256xbf16, #tpu.memory_space<vmem>>, vector<1x4x256xbf16>
    %44 = vector.shape_cast %43 : vector<1x4x256xbf16> to vector<4x256xbf16>
    %cst_24 = arith.constant dense<0.000000e+00> : vector<144x256xf32>
    %45 = tpu.matmul %42, %44, %cst_24 {dimension_numbers = #tpu.dot_dimension_numbers<[1], [0], [0], [1], [0, 0, 1, 1], [], []>} : vector<144x4xbf16>, vector<4x256xbf16>, vector<144x256xf32> -> vector<144x256xf32>
    %46 = arith.addf %40, %45 : vector<144x256xf32>
    %47 = vector.extract_strided_slice %5 {offsets = [37, 0], sizes = [144, 4], strides = [1, 1]} : vector<184x4xf32> to vector<144x4xf32>
    %48 = arith.truncf %47 : vector<144x4xf32> to vector<144x4xbf16>
    %c7 = arith.constant 7 : index
    %c0_25 = arith.constant 0 : index
    %c0_26 = arith.constant 0 : index
    %49 = vector.load %arg4[%c7, %c0_25, %c0_26] : memref<9x4x256xbf16, #tpu.memory_space<vmem>>, vector<1x4x256xbf16>
    %50 = vector.shape_cast %49 : vector<1x4x256xbf16> to vector<4x256xbf16>
    %cst_27 = arith.constant dense<0.000000e+00> : vector<144x256xf32>
    %51 = tpu.matmul %48, %50, %cst_27 {dimension_numbers = #tpu.dot_dimension_numbers<[1], [0], [0], [1], [0, 0, 1, 1], [], []>} : vector<144x4xbf16>, vector<4x256xbf16>, vector<144x256xf32> -> vector<144x256xf32>
    %52 = arith.addf %46, %51 : vector<144x256xf32>
    %53 = vector.extract_strided_slice %5 {offsets = [38, 0], sizes = [144, 4], strides = [1, 1]} : vector<184x4xf32> to vector<144x4xf32>
    %54 = arith.truncf %53 : vector<144x4xf32> to vector<144x4xbf16>
    %c8 = arith.constant 8 : index
    %c0_28 = arith.constant 0 : index
    %c0_29 = arith.constant 0 : index
    %55 = vector.load %arg4[%c8, %c0_28, %c0_29] : memref<9x4x256xbf16, #tpu.memory_space<vmem>>, vector<1x4x256xbf16>
    %56 = vector.shape_cast %55 : vector<1x4x256xbf16> to vector<4x256xbf16>
    %cst_30 = arith.constant dense<0.000000e+00> : vector<144x256xf32>
    %57 = tpu.matmul %54, %56, %cst_30 {dimension_numbers = #tpu.dot_dimension_numbers<[1], [0], [0], [1], [0, 0, 1, 1], [], []>} : vector<144x4xbf16>, vector<4x256xbf16>, vector<144x256xf32> -> vector<144x256xf32>
    %58 = arith.addf %52, %57 : vector<144x256xf32>
    %c0_31 = arith.constant 0 : index
    %c0_32 = arith.constant 0 : index
    %59 = vector.load %arg5[%c0_31, %c0_32] : memref<1x256xf32, #tpu.memory_space<vmem>>, vector<1x256xf32>
    %60 = vector.broadcast %59 : vector<1x256xf32> to vector<144x256xf32>
    %61 = arith.addf %58, %60 : vector<144x256xf32>
    %cst_33 = arith.constant 0.000000e+00 : f32
    %62 = vector.broadcast %cst_33 : f32 to vector<144x256xf32>
    %63 = arith.maximumf %61, %62 : vector<144x256xf32>
    %c0_34 = arith.constant 0 : index
    %c0_35 = arith.constant 0 : index
    %64 = vector.load %arg9[%c0_34, %c0_35] : memref<1x256xf32, #tpu.memory_space<vmem>>, vector<1x256xf32>
    %c0_36 = arith.constant 0 : index
    %c0_37 = arith.constant 0 : index
    %65 = vector.load %arg3[%c0_36, %c0_37] : memref<144x1xf32, #tpu.memory_space<vmem>>, vector<144x1xf32>
    %66 = vector.broadcast %65 : vector<144x1xf32> to vector<144x256xf32>
    %67 = arith.mulf %63, %66 : vector<144x256xf32>
    %cst_38 = arith.constant dense<0.000000e+00> : vector<256xf32>
    %68 = vector.multi_reduction <add>, %67, %cst_38 [0] : vector<144x256xf32> to vector<256xf32>
    %69 = vector.shape_cast %68 : vector<256xf32> to vector<1x256xf32>
    %70 = arith.addf %64, %69 : vector<1x256xf32>
    %c0_39 = arith.constant 0 : index
    %c0_40 = arith.constant 0 : index
    %71 = vector.load %arg9[%c0_39, %c0_40] : memref<1x256xf32, #tpu.memory_space<vmem>>, vector<1x256xf32>
    tpu.vector_store %arg9[%c0_39, %c0_40], %70 {strides = array<i32>} : memref<1x256xf32, #tpu.memory_space<vmem>>, vector<1x256xf32>,
    %c1_i32 = arith.constant 1 : i32
    %72 = arith.cmpi eq, %arg1, %c1_i32 : i32
    %73 = arith.extui %72 : i1 to i32
    %c0_i32_41 = arith.constant 0 : i32
    %74 = arith.cmpi ne, %73, %c0_i32_41 : i32
    scf.if %74 {
      %c0_42 = arith.constant 0 : index
      %c0_43 = arith.constant 0 : index
      %75 = vector.load %arg9[%c0_42, %c0_43] : memref<1x256xf32, #tpu.memory_space<vmem>>, vector<1x256xf32>
      %c0_44 = arith.constant 0 : index
      %c0_45 = arith.constant 0 : index
      %76 = vector.load %arg6[%c0_44, %c0_45] : memref<256x128xf32, #tpu.memory_space<vmem>>, vector<256x128xf32>
      %cst_46 = arith.constant dense<0.000000e+00> : vector<1x128xf32>
      %77 = tpu.matmul %75, %76, %cst_46 {dimension_numbers = #tpu.dot_dimension_numbers<[1], [0], [0], [1], [0, 0, 1, 1], [], []>} : vector<1x256xf32>, vector<256x128xf32>, vector<1x128xf32> -> vector<1x128xf32>
      %c0_47 = arith.constant 0 : index
      %c0_48 = arith.constant 0 : index
      %78 = vector.load %arg7[%c0_47, %c0_48] : memref<1x128xf32, #tpu.memory_space<vmem>>, vector<1x128xf32>
      %79 = arith.addf %77, %78 : vector<1x128xf32>
      %c0_49 = arith.constant 0 : index
      %c0_50 = arith.constant 0 : index
      %c0_51 = arith.constant 0 : index
      %80 = vector.load %arg8[%c0_49, %c0_50, %c0_51] : memref<1x1x128xf32, #tpu.memory_space<vmem>>, vector<1x1x128xf32>
      %81 = vector.shape_cast %80 : vector<1x1x128xf32> to vector<1x128xf32>
      %82 = vector.shape_cast %79 : vector<1x128xf32> to vector<1x1x128xf32>
      tpu.vector_store %arg8[%c0_49, %c0_50, %c0_51], %82 {strides = array<i32>} : memref<1x1x128xf32, #tpu.memory_space<vmem>>, vector<1x1x128xf32>,
    } else {
    }
    return
  }
  func.func @transform_0(%arg0: i32, %arg1: i32) -> (i32, i32, i32, i32) {
    %c0_i32 = arith.constant 0 : i32
    %c0_i32_0 = arith.constant 0 : i32
    %c0_i32_1 = arith.constant 0 : i32
    return %arg0, %arg1, %c0_i32, %c0_i32_0 : i32, i32, i32, i32
  }
  func.func @transform_1(%arg0: i32, %arg1: i32) -> (i32, i32) {
    %c0_i32 = arith.constant 0 : i32
    %c0_i32_0 = arith.constant 0 : i32
    %c0_i32_1 = arith.constant 0 : i32
    return %c0_i32, %c0_i32_0 : i32, i32
  }
  func.func @transform_2(%arg0: i32, %arg1: i32) -> (i32, i32, i32) {
    %c0_i32 = arith.constant 0 : i32
    %c0_i32_0 = arith.constant 0 : i32
    %c0_i32_1 = arith.constant 0 : i32
    %c0_i32_2 = arith.constant 0 : i32
    return %c0_i32, %c0_i32_0, %c0_i32_1 : i32, i32, i32
  }
  func.func @transform_3(%arg0: i32, %arg1: i32) -> (i32, i32) {
    %c0_i32 = arith.constant 0 : i32
    %c0_i32_0 = arith.constant 0 : i32
    %c0_i32_1 = arith.constant 0 : i32
    return %c0_i32, %c0_i32_0 : i32, i32
  }
  func.func @transform_4(%arg0: i32, %arg1: i32) -> (i32, i32) {
    %c0_i32 = arith.constant 0 : i32
    %c0_i32_0 = arith.constant 0 : i32
    %c0_i32_1 = arith.constant 0 : i32
    return %c0_i32, %c0_i32_0 : i32, i32
  }
  func.func @transform_5(%arg0: i32, %arg1: i32) -> (i32, i32) {
    %c0_i32 = arith.constant 0 : i32
    %c0_i32_0 = arith.constant 0 : i32
    %c0_i32_1 = arith.constant 0 : i32
    return %c0_i32, %c0_i32_0 : i32, i32
  }
  func.func @transform_6(%arg0: i32, %arg1: i32) -> (i32, i32, i32) {
    %c0_i32 = arith.constant 0 : i32
    %c0_i32_0 = arith.constant 0 : i32
    %c0_i32_1 = arith.constant 0 : i32
    return %arg0, %c0_i32, %c0_i32_0 : i32, i32, i32
  }
}

</mosaic_0001>

<bundles_post_ra>
// kernel: ensemble_forward.1
= control target key start
LH: loop header
LB: loop body
LE: loop exit
PB: predicated region body
PF: predicated region fallthrough
CT: control target
= control target key end

     0   :  { %11 = vsyncpa [#allocation4], 0  ;;  %s4482_s0 = inlined_call_operand.vmem [shape: bf16[2,2,184,4], index: 0, kind: input, shape index: {}]   ;;  %s4483_s1 = inlined_call_operand.vmem [shape: f32[144,1], index: 1, kind: input, shape index: {}]   ;;  %s4484_s2 = inlined_call_operand.vmem [shape: bf16[9,4,256], index: 2, kind: input, shape index: {}]   ;;  %s4485_s3 = inlined_call_operand.vmem [shape: f32[1,256], index: 3, kind: input, shape index: {}]   ;;  %s4486_s4 = inlined_call_operand.vmem [shape: f32[256,128], index: 4, kind: input, shape index: {}]   ;;  %s4487_s5 = inlined_call_operand.vmem [shape: f32[1,128], index: 5, kind: input, shape index: {}]   ;;  %s4488_s6 = inlined_call_operand.hbm [shape: f32[2,1,128], index: 6, kind: output, shape index: {}]  }
   0x1   :  { %13 = vsyncpa [#allocation4 + $0x1], 0  ;;  %s3532_s21 = smov 0   ;;  %s3534_s22 = smov 0  }
   0x2   :  { %s3536_s23 = smov 0   ;;  %s3538_s24 = smov 0  }
   0x3   :  { %s3540_s25 = smov 0   ;;  %s3542_s26 = smov 0  }
   0x4   :  { %s3544_s27 = smov 0   ;;  %s3546_s28 = smov 0  }
   0x5 LB: > { %s2816_s29 = sadd.s32 4294967295, %s3491_s28   ;;  %s2817_s30 = sadd.s32 4294967294, %s3491_s28   ;;  %s3491_s28 = sphi %s3546_s28, %s19_s28   ;;  %s3487_s27 = sphi %s3544_s27, %s4499_s27   ;;  %s3483_s26 = sphi %s3542_s26, %s4498_s26   ;;  %s3479_s25 = sphi %s3540_s25, %s4497_s25   ;;  %s3475_s24 = sphi %s3538_s24, %s4496_s24   ;;  %s3471_s23 = sphi %s3536_s23, %s4495_s23   ;;  %s3467_s22 = sphi %s3534_s22, %s4494_s22   ;;  %s3463_s21 = sphi %s3532_s21, %s4493_s21  }
   0x6   : > { %s28_s7 = sadd.s32 1, %s3483_s26  ;;  %s31_s8 = sadd.s32 1, %s3487_s27 }
   0x7   : > { %p29_p0 = scmp.ge.s32.totalorder %s28_s7, 2  ;;  %p181_p1 = scmp.ne.s32.totalorder %s3471_s23, %s3467_s22 }
   0x8   : > { %p182_p2 = scmp.eq.s32.totalorder %s2816_s29, 3  ;;  %p187_p4 = scmp.ne.s32.totalorder %s3467_s22, %s3463_s21 }
   0x9   : > { %s4501_s7 = smov (%p29_p0, %s28_s7), 0  ;;  %s4503_s8 = smov (!%p29_p0, %s31_s8), %s3487_s27 }
   0xa   : > { %p3581_p3 = por %p182_p2, %p181_p1  ;;  %p33_p5 = scmp.ge.s32.totalorder %s4503_s8, 2 }
   0xb   : > { %p188_p6 = scmp.eq.s32.totalorder %s2817_s30, 3  ;;  %p2820_p7 = scmp.ge.s32.totalorder %s3491_s28, 1 }
   0xc   : > { %p233_p8 = scmp.lt.s32.totalorder %s3491_s28, 5  ;;  %s4505_s8 = smov (%p33_p5, %s4503_s8), 0 }
   0xd   : > { %p3591_p9 = por %p188_p6, %p187_p4  ;;  %s168_s11 = ssub.s32 %s3487_s27, %s4505_s8 }
   0xe   : > { %p234_p10 = pnand %p2820_p7, %p233_p8  ;;  %s171_s12 = sadd.s32 1, %s3471_s23 }
   0xf   : > { %p169_p11 = scmp.eq.s32.totalorder %s168_s11, 0  ;;  %s4489_s14 = sand.u32 (!%p234_p10), 1, %s3467_s22  }
  0x10   : > { %237 = sbr.rel (%p234_p10) target bundleno = 877 (0x36d), region = 44  ;;  %p266_p12 = scmp.lt.s32.totalorder (!%p234_p10), %s3479_s25, 1 }
  0x11   : > { %s3599_s13 = scalar_select %p169_p11, %s3471_s23, %s171_s12  }
  0x12   : > { %p268_p13 = scmp.lt.s32.totalorder (!%p234_p10), %s3475_s24, 1  ;;  %s3613_s12 = scalar_lea.vmem (!%p234_p10), [#allocation3], %s4489_s14 }
  0x13   : > { %p2822_p0 = scmp.ne.s32.totalorder (!%p234_p10), %s3475_s24, 0 }
  0x17   : > { %s267_s15 = scalar_select %p266_p12, %s3479_s25, 1 }
  0x18   : > { %s269_s16 = scalar_select %p268_p13, %s3475_s24, 1 }
  0x19   : > { %s3306_s17 = smul.u32 46, %s267_s15  ;;  %v280_v0 = vlaneseq (!%p2822_p0)  ;;  %v3493_v1 = vmov (!%p2822_p0), 0.0  }
  0x1a   : > { %s3305_s18 = smul.u32 23, %s269_s16 }
  0x1b   : > { %279 = sbr.rel (%p2822_p0) target bundleno = 34 (0x22), region = 48  ;;  %vm282_vm0 = vcmp.lt.s32.totalorder (!%p2822_p0), %v280_v0, 256 }
  0x1c   : > { %s272_s19 = sadd.s32 %s3306_s17, %s3305_s18  ;;  %284 = vst.msk [vmem:[#allocation2] sm:$0x3] (!%p2822_p0), %vm282_vm0, %v3493_v1 }
  0x1d   : > { %s2821_s20 = sshll.u32 %s272_s19, 2 }
  0x1e   : > { %s3609_s11 = scalar_lea.vmem %s4482_s0, %s2821_s20 }
  0x22 PF: > { %vm458_vm1 = vcmask 1041408   ;;  %v2883_v2 = vld.sshfl [vmem:[%s4484_s2 + $0x10] sm:$0x33 pattern:$0x76325410]  ;;  %v3494_v6 = vmov 0  }
  0x23   : > { %v3619_v3 = vcombine.high %v2883_v2, %v2883_v2  ;;  %v2834_v4 = vld.sshfl [vmem:[%s4484_s2 + $0x4] sm:$0x33 pattern:$0x76325410]  ;;  %v3625_v5 = vsel %vm458_vm1, %v2883_v2, 0  ;;  %497 = vmatprep.mubr.bf16.mxu1 %v3494_v6  ;;  %1293 = vmatprep.mubr.bf16.mxu0 %v3494_v6  ;;  %v3637_v11 = vld [vmem:[%s3609_s11 + $0x8] sm:$0xff]  }
  0x24   : > { %v3630_v7 = vld [vmem:[%s3609_s11] sm:$0xff]   ;;  %v429_v8 = vcombine.high %v2834_v4, %v2834_v4  ;;  %v460_v9 = vsel %vm458_vm1, %v2834_v4, 0  ;;  %v2895_v10 = vld.sshfl [vmem:[%s4484_s2 + $0x14] sm:$0x33 pattern:$0x76325410]  ;;  %3381 = vset.pattern.permute.xlu0 %v3494_v6  ;;  %3382 = vset.pattern.permute.xlu1 %v3494_v6 }
  0x25   : > { %2884 = vmatprep.subr.msk.bf16.mxu0 %vm458_vm1, %v3619_v3  ;;  %v1450_v12 = vcombine.high %v2895_v10, %v2895_v10  ;;  %v346_v13 = vshrl.u32 %v3630_v7, 16  ;;  %v348_v14 = vshll.u32 %v3630_v7, 16  ;;  %v353_v15 = vshll.u32 %v3637_v11, 16  ;;  %v3650_v17 = vld [vmem:[%s3609_s11 + $0x10] sm:$0xff]   ;;  %v3663_v26 = vld [vmem:[%s3609_s11 + $0x18] sm:$0xff]   ;;  %v3680_v38 = vld [vmem:[%s3609_s11 + $0x20] sm:$0xff]  }
  0x26   : > { %2835 = vmatprep.subr.msk.bf16.mxu1 %vm458_vm1, %v429_v8  ;;  %1262 = vmatpush1.bf16.msra.mxu0 %v3625_v5  ;;  %vm344_vm2 = vsmask.f32 7424  ;;  %vm430_vm3 = vcmask 31744   ;;  %v357_v18 = vshrl.u32 %v3637_v11, 16  ;;  %v3657_v23 = vshll.u32 %v3650_v17, 16  ;;  %v3710_v54 = vld [vmem:[%s3609_s11 + $0x28] sm:$0xff]  }
  0x27   : > { %466 = vmatpush1.bf16.msra.mxu1 %v460_v9  ;;  %2896 = vmatprep.subr.msk.bf16.mxu0 %vm458_vm1, %v1450_v12  ;;  %v350_v16 = vrot.slane %v348_v14, 1  ;;  %v355_v19 = vrot.slane %v353_v15, 1  ;;  %v1171_v20 = vrot.slane %v353_v15, 2  ;;  %v3660_v24 = vshrl.u32 %v3650_v17, 16  ;;  %v3737_v2 = vld [vmem:[%s3609_s11 + $0x30] sm:$0xff]   ;;  %p2944_p1 = scmp.ne.s32.totalorder %s3475_s24, 1 }
  0x28   : > { %v2845_v21 = vld.sshfl [vmem:[%s4484_s2] sm:$0x33 pattern:$0x76325410]  ;;  %v1170_v25 = vrot.slane %v357_v18, 1  ;;  %v1174_v32 = vrot.slane %v3657_v23, 2 }
  0x29   : > { %v351_v22 = vor.u32 %v350_v16, %v346_v13  ;;  %v596_v27 = vcombine.high %v2845_v21, %v2845_v21  ;;  %v616_v28 = vsel %vm458_vm1, %v2845_v21, 0  ;;  %v1173_v31 = vrot.slane %v3660_v24, 1  ;;  %v3698_v47 = vld.sshfl [vmem:[%s4484_s2 + $0x18] sm:$0x33 pattern:$0x76325410] }
  0x2a   : > { %v1172_v30 = vor.u32 %v1171_v20, %v1170_v25  ;;  %vm1169_vm4 = vsmask.f32 6400  ;;  %v3672_v33 = vshll.u32 %v3663_v26, 16  ;;  %v3675_v34 = vshrl.u32 %v3663_v26, 16  ;;  %v3768_v25 = vld [vmem:[%s3609_s11 + $0x38] sm:$0xff]  }
  0x2b   : > { %v356_v29 = vsel %vm344_vm2, %v351_v22, %v355_v19  ;;  %2846 = vmatprep.subr.msk.bf16.mxu1 %vm458_vm1, %v596_v27  ;;  %v1175_v35 = vor.u32 %v1174_v32, %v1173_v31  ;;  %v359_v36 = vor.u32 %v357_v18, %v355_v19  ;;  %v363_v37 = vrot.slane %v3657_v23, 1  ;;  %v3725_v59 = vld.sshfl [vmem:[%s4484_s2 + $0x8] sm:$0x33 pattern:$0x76325410] }
  0x2c   : > { %2836 = vmatmul.mubr.msk.bf16.vlgmr.msra.gmra.mrb[0].mxu1 %vm430_vm3, %v356_v29  ;;  %v1479_v39 = vsel %vm458_vm1, %v2895_v10, 0  ;;  %v1177_v40 = vrot.slane %v3675_v34, 1  ;;  %v1178_v41 = vrot.slane %v3672_v33, 2  ;;  %v3690_v45 = vshll.u32 %v3680_v38, 16  ;;  %v304_v27 = vld [vmem:[%s3609_s11 + $0x4c] sm:$0xf] }
  0x2d   : > { %507 = vmatprep.mubr.bf16.mxu1 %v3494_v6  ;;  %622 = vmatpush1.bf16.msra.mxu1 %v616_v28  ;;  %v1176_v42 = vsel %vm1169_vm4, %v1172_v30, %v1175_v35  ;;  %v364_v43 = vsel %vm344_vm2, %v359_v36, %v363_v37  ;;  %v3693_v46 = vshrl.u32 %v3680_v38, 16  ;;  %v367_v48 = vor.u32 %v3660_v24, %v363_v37  ;;  %v303_v29 = vld [vmem:[%s3609_s11 + $0x48] sm:$0xf]  ;;  %v3783_v36 = vld [vmem:[%s3609_s11 + $0x50] sm:$0xf] }
  0x2e   : > { %2885 = vmatmul.mubr.msk.bf16.vlgmr.msra.gmra.mrb[0].mxu0 %vm430_vm3, %v1176_v42  ;;  %v1179_v44 = vor.u32 %v1178_v41, %v1177_v40  ;;  %v1661_v49 = vcombine.high %v3698_v47, %v3698_v47  ;;  %v371_v51 = vrot.slane %v3672_v33, 1  ;;  %v1182_v53 = vrot.slane %v3690_v45, 2  ;;  %v306_v37 = vld [vmem:[%s3609_s11 + $0x54] sm:$0xf] }
  0x2f   : > { %1485 = vmatpush1.bf16.msra.mxu0 %v1479_v39  ;;  %1303 = vmatprep.mubr.bf16.mxu0 %v3494_v6  ;;  %v1181_v52 = vrot.slane %v3693_v46, 1  ;;  %v3717_v57 = vshll.u32 %v3710_v54, 16  ;;  %v3720_v58 = vshrl.u32 %v3710_v54, 16  ;;  %v379_v60 = vrot.slane %v3690_v45, 1 }
  0x30   : > { %v1180_v50 = vsel %vm1169_vm4, %v1175_v35, %v1179_v44  ;;  %2910 = vmatprep.subr.msk.bf16.mxu0 %vm458_vm1, %v1661_v49  ;;  %v372_v55 = vsel %vm344_vm2, %v367_v48, %v371_v51  ;;  %v784_v61 = vcombine.high %v3725_v59, %v3725_v59  ;;  %v375_v63 = vor.u32 %v3675_v34, %v371_v51  ;;  %v3789_v39 = vld.sshfl [vmem:[%s4484_s2 + $0x1c] sm:$0x33 pattern:$0x76325410] }
  0x31   : > { %v1183_v56 = vor.u32 %v1182_v53, %v1181_v52  ;;  %v1185_v0 = vrot.slane %v3720_v58, 1  ;;  %v1186_v1 = vrot.slane %v3717_v57, 2  ;;  %v3744_v9 = vshll.u32 %v3737_v2, 16 }
  0x32   : > { %2858 = vmatprep.subr.msk.bf16.mxu1 %vm458_vm1, %v784_v61  ;;  %v380_v4 = vsel %vm344_vm2, %v375_v63, %v379_v60  ;;  %v3747_v10 = vshrl.u32 %v3737_v2, 16  ;;  %v383_v12 = vor.u32 %v3693_v46, %v379_v60  ;;  %v387_v14 = vrot.slane %v3717_v57, 1 }
  0x33   : > { %v1184_v62 = vsel %vm1169_vm4, %v1179_v44, %v1183_v56  ;;  %v1187_v8 = vor.u32 %v1186_v1, %v1185_v0  ;;  %v1190_v16 = vrot.slane %v3744_v9, 2  ;;  %v395_v22 = vrot.slane %v3744_v9, 1  ;;  %v3800_v44 = vld [vmem:[%s3609_s11 + $0x40] sm:$0xff]  }
  0x34   : > { %2837 = vmatmul.mubr.msk.bf16.gmra.mrb[4].mxu1 %vm430_vm3, %v364_v43  ;;  %v1189_v15 = vrot.slane %v3747_v10, 1  ;;  %v388_v18 = vsel %vm344_vm2, %v383_v12, %v387_v14  ;;  %v391_v21 = vor.u32 %v3720_v58, %v387_v14  ;;  %v1423_v28 = vrot.slane %v3637_v11, 2 }
  0x35   : > { %517 = vmatprep.mubr.bf16.mxu1 %v3494_v6  ;;  %v1188_v13 = vsel %vm1169_vm4, %v1183_v56, %v1187_v8  ;;  %v1424_v31 = vrot.slane %v3650_v17, 2  ;;  %v3778_v32 = vshll.u32 %v3768_v25, 16  ;;  %v3780_v35 = vcombine.low %v303_v29, %v304_v27 }
  0x36   : > { %2886 = vmatmul.mubr.msk.bf16.gmra.mrb[4].mxu0 %vm430_vm3, %v1180_v50  ;;  %v3759_v19 = vor.u32 %v1190_v16, %v1189_v15  ;;  %v396_v30 = vsel %vm344_vm2, %v391_v21, %v395_v22  ;;  %vm1422_vm5 = vcmask 1045504   ;;  %v3792_v40 = vcombine.low %v3783_v36, %v306_v37 }
  0x37   : > { %1313 = vmatprep.mubr.bf16.mxu0 %v3494_v6  ;;  %v399_v41 = vor.u32 %v3747_v10, %v395_v22  ;;  %v1425_v42 = vsel %vm1422_vm5, %v1423_v28, %v1424_v31  ;;  %v403_v43 = vrot.slane %v3778_v32, 1  ;;  %v3803_v48 = vrot.slane %v3780_v35, 2 }
  0x38   : > { %v1192_v20 = vsel %vm1169_vm4, %v1187_v8, %v3759_v19  ;;  %v1649_v49 = vrot.slane %v3792_v40, 2  ;;  %v1669_v50 = vsel %vm458_vm1, %v3698_v47, 0  ;;  %v1893_v51 = vcombine.high %v3789_v39, %v3789_v39 }
  0x39   : > { %v404_v53 = vsel %vm344_vm2, %v399_v41, %v403_v43  ;;  %v3821_v47 = vshrl.u32 %v3768_v25, 16  ;;  %v3824_v56 = vshll.u32 %v3800_v44, 16  ;;  %v3834_v63 = vcombine.low %v303_v29, %v303_v29 }
  0x3a   : > { %v3814_v52 = vsel %vm1422_vm5, %v3803_v48, %v1649_v49  ;;  %v1428_v0 = vrot.slane %v3680_v38, 2  ;;  %v1836_v12 = vrot.slane %v3660_v24, 2  ;;  %v1839_v14 = vrot.slane %v3675_v34, 2 }
  0x3b   : > { %v407_v61 = vor.u32 %v3821_v47, %v403_v43  ;;  %v417_v8 = vshll.u32 %v3834_v63, 16  ;;  %v1840_v16 = vrot.slane %v3672_v33, 3  ;;  %vm1835_vm6 = vsmask.f32 5376 }
  0x3c   : > { %2838 = vmatmul.mubr.msk.bf16.gmra.mrb[8].mxu1 %vm430_vm3, %v372_v55  ;;  %v1426_v55 = vrot.slane %v3663_v26, 2  ;;  %v1430_v33 = vrot.slane %v3710_v54, 2  ;;  %v1843_v34 = vrot.slane %v3693_v46, 2  ;;  %v1844_v27 = vrot.slane %v3690_v45, 3 }
  0x3d   : > { %527 = vmatprep.mubr.bf16.mxu1 %v3494_v6  ;;  %v1841_v22 = vor.u32 %v1840_v16, %v1839_v14  ;;  %v1432_v45 = vrot.slane %v3737_v2, 2  ;;  %v813_v46 = vsel %vm458_vm1, %v3725_v59, 0  ;;  %v1436_v43 = vrot.slane %v3800_v44, 2 }
  0x3e   : > { %2887 = vmatmul.mubr.msk.bf16.gmra.mrb[8].mxu0 %vm430_vm3, %v1184_v62  ;;  %v3829_v60 = vsel %vm1422_vm5, %v1424_v31, %v1426_v55  ;;  %v411_v62 = vrot.slane %v3824_v56, 1  ;;  %v3850_v15 = vsel %vm1422_vm5, %v1426_v55, %v1428_v0  ;;  %v1431_v28 = vsel %vm1422_vm5, %v1428_v0, %v1430_v33 }
  0x3f   : > { %1323 = vmatprep.mubr.bf16.mxu0 %v3494_v6  ;;  %v3868_v29 = vor.u32 %v1844_v27, %v1843_v34  ;;  %v1433_v41 = vsel %vm1422_vm5, %v1430_v33, %v1432_v45  ;;  %vm756_vm7 = vcmask 1046528   ;;  %v766_v14 = vrot.slane %v3710_v54, 1 }
  0x40   : > { %v412_v1 = vsel %vm344_vm2, %v407_v61, %v411_v62  ;;  %v4033_v33 = vrot.slane %v3800_v44, 1  ;;  %v1847_v34 = vrot.slane %v3720_v58, 2  ;;  %v1848_v27 = vrot.slane %v3717_v57, 3  ;;  %v2395_v57 = vld [vmem:[%s4483_s1 + $0x8] sm:$0xff] }
  0x41   : > { %v3877_v31 = vsel %vm1835_vm6, %v1841_v22, %v3868_v29  ;;  %vm2088_vm8 = vcmask 1044480  }
  0x42   : > { %v1849_v58 = vor.u32 %v1848_v27, %v1847_v34  ;;  %v1868_v34 = vshrl.u32 %v3792_v40, 16  ;;  %v1871_v27 = vshll.u32 %v3792_v40, 16 }
  0x44   : > { %2839 = vmatmul.mubr.msk.bf16.gmra.mrb[12].mxu1 %vm430_vm3, %v380_v4  ;;  %v3842_v4 = vshrl.u32 %v3800_v44, 16 }
  0x45   : > { %537 = vmatprep.mubr.bf16.mxu1 %v3494_v6 }
  0x46   : > { %2888 = vmatmul.mubr.msk.bf16.gmra.mrb[12].mxu0 %vm430_vm3, %v1188_v13  ;;  %v1837_v13 = vrot.slane %v3657_v23, 3 }
  0x47   : > { %1333 = vmatprep.mubr.bf16.mxu0 %v3494_v6 }
  0x48   : > { %v1838_v21 = vor.u32 %v1837_v13, %v1836_v12  ;;  %v764_v12 = vrot.slane %v3680_v38, 1 }
  0x4a   : > { %v3858_v23 = vsel %vm1835_vm6, %v1838_v21, %v1841_v22  ;;  %v4002_v16 = vsel %vm756_vm7, %v764_v12, %v766_v14  ;;  %v768_v21 = vrot.slane %v3737_v2, 1  ;;  %v770_v22 = vrot.slane %v3768_v25, 1 }
  0x4c   : > { %2840 = vmatmul.mubr.msk.bf16.gmra.mrb[16].mxu1 %vm430_vm3, %v388_v18  ;;  %v415_v18 = vor.u32 %v3842_v4, %v411_v62  ;;  %v1922_v62 = vsel %vm458_vm1, %v3789_v39, 0  ;;  %v757_v39 = vrot.slane %v3630_v7, 1 }
  0x4d   : > { %547 = vmatprep.mubr.bf16.mxu1 %v3494_v6 }
  0x4e   : > { %2889 = vmatmul.mubr.msk.bf16.gmra.mrb[16].mxu0 %vm430_vm3, %v1192_v20  ;;  %v419_v20 = vrot.slane %v417_v8, 1  ;;  %v760_v8 = vrot.slane %v3650_v17, 1 }
  0x4f   : > { %1516 = vmatprep.mubr.bf16.mxu0 %v3494_v6 }
  0x50   : > { %v420_v24 = vsel %vm344_vm2, %v415_v18, %v419_v20 }
  0x54   : > { %2841 = vmatmul.mubr.msk.bf16.gmra.mrb[20].mxu1 %vm430_vm3, %v396_v30  ;;  %v3873_v30 = vld.sshfl [vmem:[%s4484_s2 + $0xc] sm:$0x33 pattern:$0x76325410] }
  0x55   : > { %557 = vmatprep.mubr.bf16.mxu1 %v3494_v6  ;;  %v995_v37 = vcombine.high %v3873_v30, %v3873_v30 }
  0x56   : > { %2897 = vmatmul.mubr.msk.bf16.vlgmr.msra.gmra.mrb[0].mxu0 %vm430_vm3, %v1425_v42  ;;  %v1434_v42 = vrot.slane %v3768_v25, 2 }
  0x57   : > { %1675 = vmatpush1.bf16.msra.mxu0 %v1669_v50  ;;  %1526 = vmatprep.mubr.bf16.mxu0 %v3494_v6 }
  0x58   : > { %2922 = vmatprep.subr.msk.bf16.mxu0 %vm458_vm1, %v1893_v51  ;;  %v1435_v59 = vsel %vm1422_vm5, %v1432_v45, %v1434_v42  ;;  %v1437_v50 = vsel %vm1422_vm5, %v1434_v42, %v1436_v43  ;;  %v1439_v51 = vsel %vm1422_vm5, %v1436_v43, %v3803_v48  ;;  %v1850_v45 = vsel %vm1835_vm6, %v3868_v29, %v1849_v58  ;;  %v2398_v42 = vld [vmem:[%s4483_s1 + $0x20] sm:$0xff]  ;;  %v2401_v29 = vld [vmem:[%s4483_s1 + $0x38] sm:$0xff] }
  0x5c   : > { %2842 = vmatmul.mubr.msk.bf16.gmra.mrb[24].mxu1 %vm430_vm3, %v404_v53  ;;  %v3914_v53 = vcombine.low %v3783_v36, %v3783_v36  ;;  %v3929_v36 = vld.sshfl [vmem:[%s4484_s2 + $0x20] sm:$0x33 pattern:$0x76325410] }
  0x5d   : > { %567 = vmatprep.mubr.bf16.mxu1 %v3494_v6 }
  0x5e   : > { %2898 = vmatmul.mubr.msk.bf16.gmra.mrb[4].mxu0 %vm430_vm3, %v3829_v60  ;;  %v1440_v55 = vrot.slane %v3914_v53, 2 }
  0x5f   : > { %1536 = vmatprep.mubr.bf16.mxu0 %v3494_v6 }
  0x60   : > { %v1441_v61 = vsel %vm1422_vm5, %v3803_v48, %v1440_v55  ;;  %v2116_v48 = vcombine.high %v3929_v36, %v3929_v36  ;;  %v2402_v55 = vld [vmem:[%s4483_s1 + $0x40] sm:$0xff] }
  0x64   : > { %2843 = vmatmul.mubr.msk.bf16.gmra.mrb[28].mxu1 %vm430_vm3, %v412_v1  ;;  %v1003_v1 = vsel %vm458_vm1, %v3873_v30, 0  ;;  %v4048_v30 = vsel %vm756_vm7, %v770_v22, %v4033_v33 }
  0x65   : > { %577 = vmatprep.mubr.bf16.mxu1 %v3494_v6 }
  0x66   : > { %2899 = vmatmul.mubr.msk.bf16.gmra.mrb[8].mxu0 %vm430_vm3, %v3850_v15 }
  0x67   : > { %1546 = vmatprep.mubr.bf16.mxu0 %v3494_v6 }
  0x6c   : > { %2844 = vmatmul.mubr.msk.bf16.gmra.mrb[32].mxu1 %vm430_vm3, %v420_v24  ;;  %v4027_v24 = vsel %vm756_vm7, %v768_v21, %v770_v22  ;;  %v2410_v22 = vld [vmem:[%s4483_s1 + $0x80] sm:$0xff] }
  0x6d   : > { %653 = vmatprep.mubr.bf16.mxu1 %v3494_v6 }
  0x6e   : > { %2900 = vmatmul.mubr.msk.bf16.gmra.mrb[12].mxu0 %vm430_vm3, %v1431_v28 }
  0x6f   : > { %1556 = vmatprep.mubr.bf16.mxu0 %v3494_v6 }
  0x74   : > { %2847 = vmatmul.mubr.msk.bf16.vlgmr.msra.gmra.mrb[0].mxu1 %vm430_vm3, %v3630_v7 }
  0x75   : > { %663 = vmatprep.mubr.bf16.mxu1 %v3494_v6  ;;  %819 = vmatpush1.bf16.msra.mxu1 %v813_v46  ;;  %v774_v46 = vrot.slane %v3834_v63, 1 }
  0x76   : > { %2872 = vmatprep.subr.msk.bf16.mxu1 %vm458_vm1, %v995_v37  ;;  %2901 = vmatmul.mubr.msk.bf16.gmra.mrb[16].mxu0 %vm430_vm3, %v1433_v41  ;;  %v1851_v37 = vrot.slane %v3747_v10, 2 }
  0x77   : > { %1566 = vmatprep.mubr.bf16.mxu0 %v3494_v6  ;;  %v775_v63 = vsel %vm756_vm7, %v4033_v33, %v774_v46 }
  0x7c   : > { %2848 = vmatmul.mubr.msk.bf16.gmra.mrb[4].mxu1 %vm430_vm3, %v3637_v11 }
  0x7d   : > { %673 = vmatprep.mubr.bf16.mxu1 %v3494_v6 }
  0x7e   : > { %2902 = vmatmul.mubr.msk.bf16.gmra.mrb[20].mxu0 %vm430_vm3, %v1435_v59 }
  0x7f   : > { %1576 = vmatprep.mubr.bf16.mxu0 %v3494_v6 }
  0x84   : > { %2849 = vmatmul.mubr.msk.bf16.gmra.mrb[8].mxu1 %vm430_vm3, %v3650_v17 }
  0x85   : > { %683 = vmatprep.mubr.bf16.mxu1 %v3494_v6 }
  0x86   : > { %2903 = vmatmul.mubr.msk.bf16.gmra.mrb[24].mxu0 %vm430_vm3, %v1437_v50 }
  0x87   : > { %1586 = vmatprep.mubr.bf16.mxu0 %v3494_v6 }
  0x8c   : > { %2850 = vmatmul.mubr.msk.bf16.gmra.mrb[12].mxu1 %vm430_vm3, %v3663_v26 }
  0x8d   : > { %693 = vmatprep.mubr.bf16.mxu1 %v3494_v6 }
  0x8e   : > { %2904 = vmatmul.mubr.msk.bf16.gmra.mrb[28].mxu0 %vm430_vm3, %v1439_v51 }
  0x8f   : > { %1596 = vmatprep.mubr.bf16.mxu0 %v3494_v6 }
  0x94   : > { %2851 = vmatmul.mubr.msk.bf16.gmra.mrb[16].mxu1 %vm430_vm3, %v3680_v38 }
  0x95   : > { %703 = vmatprep.mubr.bf16.mxu1 %v3494_v6 }
  0x96   : > { %2905 = vmatmul.mubr.msk.bf16.gmra.mrb[32].mxu0 %vm430_vm3, %v1441_v61  ;;  %v2403_v61 = vld [vmem:[%s4483_s1 + $0x48] sm:$0xff] }
  0x97   : > { %1706 = vmatprep.mubr.bf16.mxu0 %v3494_v6 }
  0x9c   : > { %2852 = vmatmul.mubr.msk.bf16.gmra.mrb[20].mxu1 %vm430_vm3, %v3710_v54 }
  0x9d   : > { %713 = vmatprep.mubr.bf16.mxu1 %v3494_v6 }
  0x9e   : > { %2911 = vmatmul.mubr.msk.bf16.vlgmr.msra.gmra.mrb[0].mxu0 %vm430_vm3, %v3829_v60  ;;  %v758_v60 = vrot.slane %v3637_v11, 1  ;;  %v762_v11 = vrot.slane %v3663_v26, 1 }
  0x9f   : > { %1928 = vmatpush1.bf16.msra.mxu0 %v1922_v62  ;;  %1716 = vmatprep.mubr.bf16.mxu0 %v3494_v6  ;;  %v2404_v62 = vld [vmem:[%s4483_s1 + $0x50] sm:$0xff] }
  0xa0   : > { %2934 = vmatprep.subr.msk.bf16.mxu0 %vm458_vm1, %v2116_v48  ;;  %v759_v0 = vsel %vm756_vm7, %v757_v39, %v758_v60  ;;  %v3971_v7 = vsel %vm756_vm7, %v758_v60, %v760_v8  ;;  %v3989_v13 = vsel %vm756_vm7, %v762_v11, %v764_v12  ;;  %v2405_v48 = vld [vmem:[%s4483_s1 + $0x58] sm:$0xff]  ;;  %v1859_v60 = vrot.slane %v3842_v4, 2  ;;  %v2408_v12 = vld [vmem:[%s4483_s1 + $0x70] sm:$0xff] }
  0xa4   : > { %2853 = vmatmul.mubr.msk.bf16.gmra.mrb[24].mxu1 %vm430_vm3, %v3737_v2 }
  0xa5   : > { %723 = vmatprep.mubr.bf16.mxu1 %v3494_v6 }
  0xa6   : > { %2912 = vmatmul.mubr.msk.bf16.gmra.mrb[4].mxu0 %vm430_vm3, %v3850_v15  ;;  %v3996_v15 = vld [vmem:[%s3609_s11 + $0x58] ss:$0 sps:$4 sm:$0xff]  }
  0xa7   : > { %1726 = vmatprep.mubr.bf16.mxu0 %v3494_v6  ;;  %v1651_v18 = vrot.slane %v3996_v15, 2 }
  0xa9   : > { %v1652_v20 = vsel %vm1422_vm5, %v1649_v49, %v1651_v18  ;;  %v2145_v49 = vsel %vm458_vm1, %v3929_v36, 0 }
  0xac   : > { %2854 = vmatmul.mubr.msk.bf16.gmra.mrb[28].mxu1 %vm430_vm3, %v3768_v25 }
  0xad   : > { %733 = vmatprep.mubr.bf16.mxu1 %v3494_v6 }
  0xae   : > { %2913 = vmatmul.mubr.msk.bf16.gmra.mrb[8].mxu0 %vm430_vm3, %v1431_v28  ;;  %v2396_v28 = vld [vmem:[%s4483_s1 + $0x10] sm:$0xff] }
  0xaf   : > { %1736 = vmatprep.mubr.bf16.mxu0 %v3494_v6  ;;  %2424 = vperm.xlu1 %3382, %v2396_v28   ;;  %v1870_v28 = vrot.slane %v1868_v34, 2 }
  0xb4   : > { %2855 = vmatmul.mubr.msk.bf16.gmra.mrb[32].mxu1 %vm430_vm3, %v3800_v44 }
  0xb5   : > { %850 = vmatprep.mubr.bf16.mxu1 %v3494_v6 }
  0xb6   : > { %2914 = vmatmul.mubr.msk.bf16.gmra.mrb[12].mxu0 %vm430_vm3, %v1433_v41  ;;  %v1852_v41 = vrot.slane %v3744_v9, 3  ;;  %v2400_v9 = vld [vmem:[%s4483_s1 + $0x30] sm:$0xff] }
  0xb7   : > { %1746 = vmatprep.mubr.bf16.mxu0 %v3494_v6 }
  0xb8   : > { %v1853_v10 = vor.u32 %v1852_v41, %v1851_v37 }
  0xba   : > { %v1854_v43 = vsel %vm1835_vm6, %v1849_v58, %v1853_v10  ;;  %v1873_v58 = vrot.slane %v1871_v27, 3 }
  0xbc   : > { %2859 = vmatmul.mubr.msk.bf16.vlgmr.msra.gmra.mrb[0].mxu1 %vm430_vm3, %v759_v0  ;;  %v1860_v0 = vrot.slane %v3824_v56, 3 }
  0xbd   : > { %860 = vmatprep.mubr.bf16.mxu1 %v3494_v6  ;;  %1009 = vmatpush1.bf16.msra.mxu1 %v1003_v1  ;;  %v2406_v1 = vld [vmem:[%s4483_s1 + $0x60] sm:$0xff] }
  0xbe   : > { %3015 = vmatprep.subr.msk.bf16.mxu1 %vm458_vm1, %v3619_v3  ;;  %2915 = vmatmul.mubr.msk.bf16.gmra.mrb[16].mxu0 %vm430_vm3, %v1435_v59  ;;  %v3980_v3 = vsel %vm756_vm7, %v760_v8, %v762_v11  ;;  %v2399_v59 = vld [vmem:[%s4483_s1 + $0x28] sm:$0xff]  ;;  %v1205_v11 = vshll.u32 %v3780_v35, 16 }
  0xbf   : > { %1756 = vmatprep.mubr.bf16.mxu0 %v3494_v6  ;;  %v2407_v8 = vld [vmem:[%s4483_s1 + $0x68] sm:$0xff] }
  0xc4   : > { %2860 = vmatmul.mubr.msk.bf16.gmra.mrb[4].mxu1 %vm430_vm3, %v3971_v7 }
  0xc5   : > { %870 = vmatprep.mubr.bf16.mxu1 %v3494_v6 }
  0xc6   : > { %2916 = vmatmul.mubr.msk.bf16.gmra.mrb[20].mxu0 %vm430_vm3, %v1437_v50  ;;  %v1855_v50 = vrot.slane %v3821_v47, 2 }
  0xc7   : > { %1766 = vmatprep.mubr.bf16.mxu0 %v3494_v6 }
  0xcc   : > { %2861 = vmatmul.mubr.msk.bf16.gmra.mrb[8].mxu1 %vm430_vm3, %v3980_v3 }
  0xcd   : > { %880 = vmatprep.mubr.bf16.mxu1 %v3494_v6 }
  0xce   : > { %2917 = vmatmul.mubr.msk.bf16.gmra.mrb[24].mxu0 %vm430_vm3, %v1439_v51  ;;  %v1856_v51 = vrot.slane %v3778_v32, 3 }
  0xcf   : > { %1776 = vmatprep.mubr.bf16.mxu0 %v3494_v6 }
  0xd0   : > { %v1857_v36 = vor.u32 %v1856_v51, %v1855_v50 }
  0xd2   : > { %v1858_v39 = vsel %vm1835_vm6, %v1853_v10, %v1857_v36  ;;  %v2094_v10 = vrot.slane %v3710_v54, 3  ;;  %v1194_v54 = vrot.slane %v3778_v32, 2  ;;  %v1198_v32 = vrot.slane %v3824_v56, 2 }
  0xd3   : > { %v1207_v56 = vrot.slane %v1205_v11, 2 }
  0xd4   : > { %2862 = vmatmul.mubr.msk.bf16.gmra.mrb[12].mxu1 %vm430_vm3, %v3989_v13 }
  0xd5   : > { %890 = vmatprep.mubr.bf16.mxu1 %v3494_v6 }
  0xd6   : > { %2918 = vmatmul.mubr.msk.bf16.gmra.mrb[28].mxu0 %vm430_vm3, %v3814_v52  ;;  %v4015_v52 = vsel %vm756_vm7, %v766_v14, %v768_v21  ;;  %v2409_v14 = vld [vmem:[%s4483_s1 + $0x78] sm:$0xff]  ;;  %v1864_v21 = vrot.slane %v1205_v11, 3  ;;  %v2106_v11 = vrot.slane %v3996_v15, 3 }
  0xd7   : > { %1786 = vmatprep.mubr.bf16.mxu0 %v3494_v6 }
  0xdc   : > { %2863 = vmatmul.mubr.msk.bf16.gmra.mrb[16].mxu1 %vm430_vm3, %v4002_v16 }
  0xdd   : > { %900 = vmatprep.mubr.bf16.mxu1 %v3494_v6 }
  0xde   : > { %2919 = vmatmul.mubr.msk.bf16.gmra.mrb[32].mxu0 %vm430_vm3, %v1652_v20 }
  0xdf   : > { %1959 = vmatprep.mubr.bf16.mxu0 %v3494_v6 }
  0xe4   : > { %2864 = vmatmul.mubr.msk.bf16.gmra.mrb[20].mxu1 %vm430_vm3, %v4015_v52 }
  0xe5   : > { %910 = vmatprep.mubr.bf16.mxu1 %v3494_v6 }
  0xe6   : > { %2923 = vmatmul.mubr.msk.bf16.vlgmr.msra.gmra.mrb[0].mxu0 %vm430_vm3, %v3858_v23  ;;  %v2394_v23 = vld [vmem:[%s4483_s1] sm:$0xff] }
  0xe7   : > { %2151 = vmatpush1.bf16.msra.mxu0 %v2145_v49  ;;  %1969 = vmatprep.mubr.bf16.mxu0 %v3494_v6 }
  0xe8   : > { %2414 = vperm.xlu0 %3381, %v2394_v23  }
  0xec   : > { %2865 = vmatmul.mubr.msk.bf16.gmra.mrb[24].mxu1 %vm430_vm3, %v4027_v24  ;;  %2419 = vperm.xlu0 %3381, %v2395_v57   ;;  %v1874_v57 = vor.u32 %v1873_v58, %v1870_v28 }
  0xed   : > { %920 = vmatprep.mubr.bf16.mxu1 %v3494_v6 }
  0xee   : > { %2924 = vmatmul.mubr.msk.bf16.gmra.mrb[4].mxu0 %vm430_vm3, %v3877_v31  ;;  %v2397_v31 = vld [vmem:[%s4483_s1 + $0x18] sm:$0xff] }
  0xef   : > { %1979 = vmatprep.mubr.bf16.mxu0 %v3494_v6  ;;  %2429 = vperm.xlu1 %3382, %v2397_v31   ;;  %v1877_v31 = vshrl.u32 %v3996_v15, 16 }
  0xf0   : > { %2434 = vperm.xlu0 %3381, %v2398_v42  }
  0xf1   : > { %v1879_v46 = vrot.slane %v1877_v31, 2  ;;  %v2311_v31 = vlaneseq }
  0xf3   : > { %2439 = vperm.xlu1 %3382, %v2399_v59   ;;  %v2090_v59 = vrot.slane %v3663_v26, 3  ;;  %v983_v26 = vrot.slane %v3780_v35, 1  ;;  %vm2605_vm9 = vcmp.lt.s32.totalorder %v2311_v31, 256 }
  0xf4   : > { %2866 = vmatmul.mubr.msk.bf16.gmra.mrb[28].mxu1 %vm430_vm3, %v4048_v30  ;;  %2444 = vperm.xlu0 %3381, %v2400_v9  }
  0xf5   : > { %930 = vmatprep.mubr.bf16.mxu1 %v3494_v6 }
  0xf6   : > { %2925 = vmatmul.mubr.msk.bf16.gmra.mrb[8].mxu0 %vm430_vm3, %v1850_v45  ;;  %v1880_v45 = vshll.u32 %v3996_v15, 16 }
  0xf7   : > { %1989 = vmatprep.mubr.bf16.mxu0 %v3494_v6  ;;  %2449 = vperm.xlu1 %3382, %v2401_v29   ;;  %v2096_v29 = vrot.slane %v3737_v2, 3  ;;  %v2098_v2 = vrot.slane %v3768_v25, 3 }
  0xf8   : > { %2454 = vperm.xlu0 %3381, %v2402_v55   ;;  %v1882_v37 = vrot.slane %v1880_v45, 3 }
  0xf9   : > { %v2099_v55 = vsel %vm2088_vm8, %v2096_v29, %v2098_v2 }
  0xfa   : > { %v1883_v41 = vor.u32 %v1882_v37, %v1879_v46 }
  0xfb   : > { %2459 = vperm.xlu1 %3382, %v2403_v61  }
  0xfc   : > { %2867 = vmatmul.mubr.msk.bf16.gmra.mrb[32].mxu1 %vm430_vm3, %v775_v63  ;;  %2464 = vperm.xlu0 %3381, %v2404_v62   ;;  %v1884_v42 = vsel %vm1835_vm6, %v1874_v57, %v1883_v41  ;;  %v4258_v41 = vshrl.u32 %v2311_v31, 7  ;;  %v2614_v31 = vld [vmem:[%s4486_s4 + $0x8] sm:$0xff] (!%p2944_p1) }
  0xfd   : > { %1040 = vmatprep.mubr.bf16.mxu1 %v3494_v6 }
  0xfe   : > { %2926 = vmatmul.mubr.msk.bf16.gmra.mrb[12].mxu0 %vm430_vm3, %v1854_v43  ;;  %v2097_v43 = vsel %vm2088_vm8, %v2094_v10, %v2096_v29 }
  0xff   : > { %1999 = vmatprep.mubr.bf16.mxu0 %v3494_v6  ;;  %2469 = vperm.xlu1 %3382, %v2405_v48   ;;  %v1211_v48 = vshrl.u32 %v3914_v53, 16 }
 0x100   : > { %2474 = vperm.xlu0 %3381, %v2406_v1  }
 0x103   : > { %2479 = vperm.xlu1 %3382, %v2407_v8  }
 0x104   : > { %2873 = vmatmul.mubr.msk.bf16.vlgmr.msra.gmra.mrb[0].mxu1 %vm430_vm3, %v3971_v7  ;;  %v1861_v7 = vor.u32 %v1860_v0, %v1859_v60  ;;  %2484 = vperm.xlu0 %3381, %v2408_v12   ;;  %v2102_v60 = vrot.slane %v3780_v35, 3  ;;  %v1213_v0 = vrot.slane %v1211_v48, 1 }
 0x105   : > { %1050 = vmatprep.mubr.bf16.mxu1 %v3494_v6  ;;  %3016 = vmatpush1.bf16.msra.mxu1 %v3625_v5  ;;  %v1202_v5 = vshrl.u32 %v3780_v35, 16 }
 0x106   : > { %2927 = vmatmul.mubr.msk.bf16.gmra.mrb[16].mxu0 %vm430_vm3, %v1858_v39  ;;  %v1862_v18 = vsel %vm1835_vm6, %v1857_v36, %v1861_v7  ;;  %v1214_v39 = vshll.u32 %v3914_v53, 16 }
 0x107   : > { %2009 = vmatprep.mubr.bf16.mxu0 %v3494_v6  ;;  %v1863_v20 = vrot.slane %v1202_v5, 2  ;;  %2489 = vperm.xlu1 %3382, %v2409_v14   ;;  %v1204_v25 = vrot.slane %v1202_v5, 1  ;;  %v2104_v5 = vrot.slane %v3792_v40, 3 }
 0x108   : > { %2494 = vperm.xlu0 %3381, %v2410_v22   ;;  %v1216_v1 = vrot.slane %v1214_v39, 2 }
 0x109   : > { %v1865_v49 = vor.u32 %v1864_v21, %v1863_v20  ;;  %v1208_v62 = vor.u32 %v1207_v56, %v1204_v25  ;;  %v2105_v35 = vsel %vm2088_vm8, %v2102_v60, %v2104_v5  ;;  %v2107_v12 = vsel %vm2088_vm8, %v2104_v5, %v2106_v11 }
 0x10b   : > { %v1866_v23 = vsel %vm1835_vm6, %v1861_v7, %v1865_v49  ;;  %v1217_v7 = vor.u32 %v1216_v1, %v1213_v0 }
 0x10c   : > { %2874 = vmatmul.mubr.msk.bf16.gmra.mrb[4].mxu1 %vm430_vm3, %v3980_v3  ;;  %v2411_v3 = vld [vmem:[%s4483_s1 + $0x88] sm:$0xff] }
 0x10d   : > { %1060 = vmatprep.mubr.bf16.mxu1 %v3494_v6  ;;  %2499 = vperm.xlu1 %3382, %v2411_v3  }
 0x10e   : > { %2928 = vmatmul.mubr.msk.bf16.gmra.mrb[20].mxu0 %vm430_vm3, %v1862_v18 }
 0x10f   : > { %2019 = vmatprep.mubr.bf16.mxu0 %v3494_v6 }
 0x114   : > { %2875 = vmatmul.mubr.msk.bf16.gmra.mrb[8].mxu1 %vm430_vm3, %v3989_v13  ;;  %v1875_v13 = vsel %vm1835_vm6, %v1865_v49, %v1874_v57 }
 0x115   : > { %1070 = vmatprep.mubr.bf16.mxu1 %v3494_v6 }
 0x116   : > { %2929 = vmatmul.mubr.msk.bf16.gmra.mrb[24].mxu0 %vm430_vm3, %v1866_v23 }
 0x117   : > { %2029 = vmatprep.mubr.bf16.mxu0 %v3494_v6 }
 0x11c   : > { %2876 = vmatmul.mubr.msk.bf16.gmra.mrb[12].mxu1 %vm430_vm3, %v4002_v16  ;;  %v2089_v16 = vrot.slane %v3650_v17, 3 }
 0x11d   : > { %1080 = vmatprep.mubr.bf16.mxu1 %v3494_v6 }
 0x11e   : > { %2930 = vmatmul.mubr.msk.bf16.gmra.mrb[28].mxu0 %vm430_vm3, %v1875_v13  ;;  %v2091_v63 = vsel %vm2088_vm8, %v2089_v16, %v2090_v59  ;;  %v2309_v16 = vld [vmem:[%s4485_s3] sm:$0x3] }
 0x11f   : > { %2039 = vmatprep.mubr.bf16.mxu0 %v3494_v6 }
 0x124   : > { %2877 = vmatmul.mubr.msk.bf16.gmra.mrb[16].mxu1 %vm430_vm3, %v4015_v52  ;;  %v2092_v52 = vrot.slane %v3680_v38, 3 }
 0x125   : > { %1090 = vmatprep.mubr.bf16.mxu1 %v3494_v6 }
 0x126   : > { %2931 = vmatmul.mubr.msk.bf16.gmra.mrb[32].mxu0 %vm430_vm3, %v1884_v42  ;;  %v2093_v17 = vsel %vm2088_vm8, %v2090_v59, %v2092_v52  ;;  %v2095_v38 = vsel %vm2088_vm8, %v2092_v52, %v2094_v10  ;;  %v2313_v42 = vsub.s32 0, %v4258_v41  ;;  %v2317_v59 = vsub.s32 1, %v4258_v41 }
 0x127   : > { %2182 = vmatprep.mubr.bf16.mxu0 %v3494_v6 }
 0x12c   : > { %2878 = vmatmul.mubr.msk.bf16.gmra.mrb[20].mxu1 %vm430_vm3, %v4027_v24  ;;  %v984_v24 = vsel %vm756_vm7, %v4033_v33, %v983_v26  ;;  %v1193_v33 = vrot.slane %v3821_v47, 1  ;;  %v1197_v47 = vrot.slane %v3842_v4, 1 }
 0x12d   : > { %1100 = vmatprep.mubr.bf16.mxu1 %v3494_v6 }
 0x12e   : > { %2935 = vmatmul.mubr.msk.bf16.vlgmr.msra.gmra.mrb[0].mxu0 %vm430_vm3, %v2091_v63  ;;  %v1195_v50 = vor.u32 %v1194_v54, %v1193_v33  ;;  %v1199_v61 = vor.u32 %v1198_v32, %v1197_v47  ;;  %v4267_v63 = vrot.slane %v2309_v16, %v2313_v42  ;;  %v2425_v39 = vpop.permute.xlu1 %2424 }
 0x12f   : > { %2192 = vmatprep.mubr.bf16.mxu0 %v3494_v6 }
 0x130   : > { %v1196_v51 = vsel %vm1169_vm4, %v3759_v19, %v1195_v50  ;;  %v1200_v36 = vsel %vm1169_vm4, %v1195_v50, %v1199_v61  ;;  %v2100_v19 = vrot.slane %v3800_v44, 3  ;;  %v1209_v44 = vsel %vm1169_vm4, %v1199_v61, %v1208_v62 }
 0x132   : > { %v2101_v4 = vsel %vm2088_vm8, %v2098_v2, %v2100_v19  ;;  %v2103_v8 = vsel %vm2088_vm8, %v2100_v19, %v2102_v60 }
 0x134   : > { %2879 = vmatmul.mubr.msk.bf16.gmra.mrb[24].mxu1 %vm430_vm3, %v4048_v30  ;;  %v985_v30 = vrot.slane %v3914_v53, 1  ;;  %v1218_v53 = vsel %vm1169_vm4, %v1208_v62, %v1217_v7 }
 0x135   : > { %1110 = vmatprep.mubr.bf16.mxu1 %v3494_v6 }
 0x136   : > { %2936 = vmatmul.mubr.msk.bf16.gmra.mrb[4].mxu0 %vm430_vm3, %v2093_v17  ;;  %v986_v9 = vsel %vm756_vm7, %v983_v26, %v985_v30  ;;  %v4271_v17 = vrot.slane %v2309_v16, %v2317_v59 }
 0x137   : > { %2202 = vmatprep.mubr.bf16.mxu0 %v3494_v6 }
 0x13c   : > { %2880 = vmatmul.mubr.msk.bf16.gmra.mrb[28].mxu1 %vm430_vm3, %v984_v24 }
 0x13d   : > { %1120 = vmatprep.mubr.bf16.mxu1 %v3494_v6 }
 0x13e   : > { %2937 = vmatmul.mubr.msk.bf16.gmra.mrb[8].mxu0 %vm430_vm3, %v2095_v38 }
 0x13f   : > { %2212 = vmatprep.mubr.bf16.mxu0 %v3494_v6 }
 0x144   : > { %2881 = vmatmul.mubr.msk.bf16.gmra.mrb[32].mxu1 %vm430_vm3, %v986_v9 }
 0x145   : > { %1343 = vmatprep.mubr.bf16.mxu1 %v3494_v6 }
 0x146   : > { %2938 = vmatmul.mubr.msk.bf16.gmra.mrb[12].mxu0 %vm430_vm3, %v2097_v43 }
 0x147   : > { %2222 = vmatprep.mubr.bf16.mxu0 %v3494_v6 }
 0x14c   : > { %2890 = vmatmul.mubr.msk.bf16.vlgmr.msra.gmra.mrb[20].mxu1 %vm430_vm3, %v1196_v51 }
 0x14d   : > { %1353 = vmatprep.mubr.bf16.mxu1 %v3494_v6 }
 0x14e   : > { %2939 = vmatmul.mubr.msk.bf16.gmra.mrb[16].mxu0 %vm430_vm3, %v2099_v55 }
 0x14f   : > { %2232 = vmatprep.mubr.bf16.mxu0 %v3494_v6 }
 0x154   : > { %2891 = vmatmul.mubr.msk.bf16.gmra.mrb[24].mxu1 %vm430_vm3, %v1200_v36 }
 0x155   : > { %1363 = vmatprep.mubr.bf16.mxu1 %v3494_v6 }
 0x156   : > { %2940 = vmatmul.mubr.msk.bf16.gmra.mrb[20].mxu0 %vm430_vm3, %v2101_v4 }
 0x157   : > { %2242 = vmatprep.mubr.bf16.mxu0 %v3494_v6 }
 0x15c   : > { %2892 = vmatmul.mubr.msk.bf16.gmra.mrb[28].mxu1 %vm430_vm3, %v1209_v44 }
 0x15d   : > { %1373 = vmatprep.mubr.bf16.mxu1 %v3494_v6 }
 0x15e   : > { %2941 = vmatmul.mubr.msk.bf16.gmra.mrb[24].mxu0 %vm430_vm3, %v2103_v8 }
 0x15f   : > { %2252 = vmatprep.mubr.bf16.mxu0 %v3494_v6 }
 0x164   : > { %2893 = vmatmul.mubr.msk.bf16.gmra.mrb[32].mxu1 %vm430_vm3, %v1218_v53 }
 0x166   : > { %2942 = vmatmul.mubr.msk.bf16.gmra.mrb[28].mxu0 %vm430_vm3, %v2105_v35 }
 0x167   : > { %2262 = vmatprep.mubr.bf16.mxu0 %v3494_v6  ;;  %v2415_v26 = vpop.permute.xlu0 %2414 }
 0x16b   : > { %v2420_v32 = vpop.permute.xlu0 %2419 }
 0x16e   : > { %2943 = vmatmul.mubr.msk.bf16.gmra.mrb[32].mxu0 %vm430_vm3, %v2107_v12  ;;  %v2430_v16 = vpop.permute.xlu1 %2429 }
 0x1d7   : > { %v1042_v14 = vpop.f32.mrb[0].mxu1 }
 0x1d8   : > { %v1044_v18 = vpop.f32.mrb[1].mxu1 }
 0x1d9   : > { %v1046_v20 = vpop.f32.mrb[2].mxu1 }
 0x1da   : > { %v1048_v21 = vpop.f32.mrb[3].mxu1 }
 0x1df   : > { %v1052_v22 = vpop.f32.mrb[4].mxu1 }
 0x1e0   : > { %v1054_v40 = vpop.f32.mrb[5].mxu1 }
 0x1e1   : > { %v1056_v3 = vpop.f32.mrb[6].mxu1 }
 0x1e2   : > { %v1058_v49 = vpop.f32.mrb[7].mxu1 }
 0x1e7   : > { %v4233_v34 = vpop.f32.mrb[8].mxu1 }
 0x1e8   : > { %v4235_v27 = vpop.f32.mrb[9].mxu1 }
 0x1e9   : > { %v4237_v23 = vpop.f32.mrb[10].mxu1 }
 0x1ea   : > { %v4239_v6 = vpop.f32.mrb[11].mxu1 }
 0x1ef   : > { %v4241_v15 = vpop.f32.mrb[12].mxu1 }
 0x1f0   : > { %v4243_v28 = vpop.f32.mrb[13].mxu1 }
 0x1f1   : > { %v4245_v58 = vpop.f32.mrb[14].mxu1 }
 0x1f2   : > { %v4247_v57 = vpop.f32.mrb[15].mxu1 }
 0x1f7   : > { %v4249_v45 = vpop.f32.mrb[16].mxu1 }
 0x1f8   : > { %v4251_v13 = vpop.f32.mrb[17].mxu1 }
 0x1f9   : > { %v4253_v46 = vpop.f32.mrb[18].mxu1 }
 0x1fa   : > { %v4255_v37 = vpop.f32.mrb[19].mxu1 }
 0x201   : > { %v2184_v52 = vpop.f32.mrb[0].mxu0 }
 0x202   : > { %v3017_v24 = vadd.f32 %v2184_v52, %v1042_v14  ;;  %v2186_v10 = vpop.f32.mrb[1].mxu0 }
 0x203   : > { %v3018_v38 = vadd.f32 %v2186_v10, %v1044_v18  ;;  %v2188_v30 = vpop.f32.mrb[2].mxu0 }
 0x204   : > { %v2321_v9 = vadd.f32 %v3017_v24, %v4267_v63  ;;  %v3019_v29 = vadd.f32 %v2188_v30, %v1046_v20  ;;  %v2190_v33 = vpop.f32.mrb[3].mxu0 }
 0x205   : > { %v2322_v54 = vadd.f32 %v3018_v38, %v4271_v17  ;;  %v3020_v43 = vadd.f32 %v2190_v33, %v1048_v21 }
 0x206   : > { %v2357_v50 = vmax.f32 %v2321_v9, 0.0  ;;  %v2323_v51 = vadd.f32 %v3019_v29, %v4267_v63 }
 0x207   : > { %v2358_v2 = vmax.f32 %v2322_v54, 0.0  ;;  %v2324_v47 = vadd.f32 %v3020_v43, %v4271_v17 }
 0x208   : > { %v2359_v55 = vmax.f32 %v2323_v51, 0.0  ;;  %v2502_v19 = vmul.f32 %v2415_v26, %v2357_v50 }
 0x209   : > { %v2360_v61 = vmax.f32 %v2324_v47, 0.0  ;;  %v2194_v36 = vpop.f32.mrb[4].mxu0  ;;  %v2503_v62 = vmul.f32 %v2415_v26, %v2358_v2 }
 0x20a   : > { %v2504_v25 = vmul.f32 %v2420_v32, %v2359_v55  ;;  %v3021_v56 = vadd.f32 %v2194_v36, %v1052_v22  ;;  %v2196_v4 = vpop.f32.mrb[5].mxu0 }
 0x20b   : > { %v2505_v48 = vmul.f32 %v2420_v32, %v2360_v61  ;;  %v3022_v44 = vadd.f32 %v2196_v4, %v1054_v40  ;;  %v2198_v60 = vpop.f32.mrb[6].mxu0  ;;  %v2435_v32 = vpop.permute.xlu0 %2434 }
 0x20c   : > { %v2538_v0 = vadd.f32 %v2504_v25, %v2502_v19  ;;  %v2325_v1 = vadd.f32 %v3021_v56, %v4267_v63  ;;  %v3023_v8 = vadd.f32 %v2198_v60, %v1056_v3  ;;  %v2200_v7 = vpop.f32.mrb[7].mxu0  ;;  %v2440_v19 = vpop.permute.xlu1 %2439 }
 0x20d   : > { %v2561_v53 = vadd.f32 %v2505_v48, %v2503_v62  ;;  %v2326_v5 = vadd.f32 %v3022_v44, %v4271_v17  ;;  %v3024_v35 = vadd.f32 %v2200_v7, %v1058_v49 }
 0x20e   : > { %v2361_v11 = vmax.f32 %v2325_v1, 0.0  ;;  %v2327_v12 = vadd.f32 %v3023_v8, %v4267_v63 }
 0x20f   : > { %v2362_v14 = vmax.f32 %v2326_v5, 0.0  ;;  %v2328_v18 = vadd.f32 %v3024_v35, %v4271_v17 }
 0x210   : > { %v2506_v20 = vmul.f32 %v2425_v39, %v2361_v11  ;;  %v2363_v21 = vmax.f32 %v2327_v12, 0.0 }
 0x211   : > { %v2507_v22 = vmul.f32 %v2425_v39, %v2362_v14  ;;  %v2364_v40 = vmax.f32 %v2328_v18, 0.0  ;;  %v2204_v52 = vpop.f32.mrb[8].mxu0 }
 0x212   : > { %v2539_v26 = vadd.f32 %v2538_v0, %v2506_v20  ;;  %v2508_v24 = vmul.f32 %v2430_v16, %v2363_v21  ;;  %v3025_v3 = vadd.f32 %v2204_v52, %v4233_v34  ;;  %v2206_v10 = vpop.f32.mrb[9].mxu0  ;;  %v2445_v20 = vpop.permute.xlu0 %2444 }
 0x213   : > { %v2509_v38 = vmul.f32 %v2430_v16, %v2364_v40  ;;  %v2562_v30 = vadd.f32 %v2561_v53, %v2507_v22  ;;  %v3026_v49 = vadd.f32 %v2206_v10, %v4235_v27  ;;  %v2208_v9 = vpop.f32.mrb[10].mxu0 }
 0x214   : > { %v2540_v29 = vadd.f32 %v2539_v26, %v2508_v24  ;;  %v2329_v33 = vadd.f32 %v3025_v3, %v4267_v63  ;;  %v3027_v54 = vadd.f32 %v2208_v9, %v4237_v23  ;;  %v2210_v43 = vpop.f32.mrb[11].mxu0 }
 0x215   : > { %v2563_v50 = vadd.f32 %v2562_v30, %v2509_v38  ;;  %v2330_v51 = vadd.f32 %v3026_v49, %v4271_v17  ;;  %v3028_v2 = vadd.f32 %v2210_v43, %v4239_v6 }
 0x216   : > { %v2365_v47 = vmax.f32 %v2329_v33, 0.0  ;;  %v2331_v34 = vadd.f32 %v3027_v54, %v4267_v63 }
 0x217   : > { %v2366_v55 = vmax.f32 %v2330_v51, 0.0  ;;  %v2332_v61 = vadd.f32 %v3028_v2, %v4271_v17 }
 0x218   : > { %v2510_v27 = vmul.f32 %v2435_v32, %v2365_v47  ;;  %v2367_v36 = vmax.f32 %v2331_v34, 0.0 }
 0x219   : > { %v2511_v25 = vmul.f32 %v2435_v32, %v2366_v55  ;;  %v2368_v56 = vmax.f32 %v2332_v61, 0.0  ;;  %v2214_v4 = vpop.f32.mrb[12].mxu0 }
 0x21a   : > { %v2541_v23 = vadd.f32 %v2540_v29, %v2510_v27  ;;  %v2512_v62 = vmul.f32 %v2440_v19, %v2367_v36  ;;  %v3029_v48 = vadd.f32 %v2214_v4, %v4241_v15  ;;  %v2216_v39 = vpop.f32.mrb[13].mxu0  ;;  %v2455_v27 = vpop.permute.xlu0 %2454 }
 0x21b   : > { %v2564_v44 = vadd.f32 %v2563_v50, %v2511_v25  ;;  %v2513_v6 = vmul.f32 %v2440_v19, %v2368_v56  ;;  %v3030_v60 = vadd.f32 %v2216_v39, %v4243_v28  ;;  %v2218_v0 = vpop.f32.mrb[14].mxu0 }
 0x21c   : > { %v2542_v1 = vadd.f32 %v2541_v23, %v2512_v62  ;;  %v2333_v8 = vadd.f32 %v3029_v48, %v4267_v63  ;;  %v3031_v7 = vadd.f32 %v2218_v0, %v4245_v58  ;;  %v2220_v53 = vpop.f32.mrb[15].mxu0  ;;  %v2450_v58 = vpop.permute.xlu1 %2449 }
 0x21d   : > { %v2565_v5 = vadd.f32 %v2564_v44, %v2513_v6  ;;  %v2334_v35 = vadd.f32 %v3030_v60, %v4271_v17  ;;  %v3032_v11 = vadd.f32 %v2220_v53, %v4247_v57 }
 0x21e   : > { %v2369_v14 = vmax.f32 %v2333_v8, 0.0  ;;  %v2335_v15 = vadd.f32 %v3031_v7, %v4267_v63 }
 0x21f   : > { %v1345_v12 = vpop.f32.mrb[20].mxu1  ;;  %v2370_v21 = vmax.f32 %v2334_v35, 0.0  ;;  %v2336_v28 = vadd.f32 %v3032_v11, %v4271_v17 }
 0x220   : > { %v1347_v18 = vpop.f32.mrb[21].mxu1  ;;  %v2514_v40 = vmul.f32 %v2445_v20, %v2369_v14  ;;  %v2371_v16 = vmax.f32 %v2335_v15, 0.0 }
 0x221   : > { %v1349_v22 = vpop.f32.mrb[22].mxu1  ;;  %v2515_v26 = vmul.f32 %v2445_v20, %v2370_v21  ;;  %v2372_v24 = vmax.f32 %v2336_v28, 0.0  ;;  %v2224_v3 = vpop.f32.mrb[16].mxu0 }
 0x222   : > { %v1351_v52 = vpop.f32.mrb[23].mxu1  ;;  %v2543_v10 = vadd.f32 %v2542_v1, %v2514_v40  ;;  %v2516_v38 = vmul.f32 %v2450_v58, %v2371_v16  ;;  %v3033_v57 = vadd.f32 %v2224_v3, %v4249_v45  ;;  %v2226_v30 = vpop.f32.mrb[17].mxu0 }
 0x223   : > { %v2566_v49 = vadd.f32 %v2565_v5, %v2515_v26  ;;  %v2517_v9 = vmul.f32 %v2450_v58, %v2372_v24  ;;  %v3034_v29 = vadd.f32 %v2226_v30, %v4251_v13  ;;  %v2228_v33 = vpop.f32.mrb[18].mxu0 }
 0x224   : > { %v2544_v54 = vadd.f32 %v2543_v10, %v2516_v38  ;;  %v2337_v43 = vadd.f32 %v3033_v57, %v4267_v63  ;;  %v3035_v50 = vadd.f32 %v2228_v33, %v4253_v46  ;;  %v2230_v51 = vpop.f32.mrb[19].mxu0  ;;  %v2460_v46 = vpop.permute.xlu1 %2459 }
 0x225   : > { %v2567_v2 = vadd.f32 %v2566_v49, %v2517_v9  ;;  %v2338_v47 = vadd.f32 %v3034_v29, %v4271_v17  ;;  %v3036_v34 = vadd.f32 %v2230_v51, %v4255_v37 }
 0x226   : > { %v2373_v55 = vmax.f32 %v2337_v43, 0.0  ;;  %v2339_v45 = vadd.f32 %v3035_v50, %v4267_v63 }
 0x227   : > { %v1355_v32 = vpop.f32.mrb[24].mxu1  ;;  %v2374_v36 = vmax.f32 %v2338_v47, 0.0  ;;  %v2340_v13 = vadd.f32 %v3036_v34, %v4271_v17 }
 0x228   : > { %v1357_v61 = vpop.f32.mrb[25].mxu1  ;;  %v2518_v25 = vmul.f32 %v2455_v27, %v2373_v55  ;;  %v2375_v56 = vmax.f32 %v2339_v45, 0.0  ;;  %v2470_v10 = vpop.permute.xlu1 %2469 }
 0x229   : > { %v1359_v19 = vpop.f32.mrb[26].mxu1  ;;  %v2519_v23 = vmul.f32 %v2455_v27, %v2374_v36  ;;  %v2376_v62 = vmax.f32 %v2340_v13, 0.0  ;;  %v2234_v48 = vpop.f32.mrb[20].mxu0 }
 0x22a   : > { %v1361_v4 = vpop.f32.mrb[27].mxu1  ;;  %v2545_v39 = vadd.f32 %v2544_v54, %v2518_v25  ;;  %v2520_v44 = vmul.f32 %v2460_v46, %v2375_v56  ;;  %v3037_v37 = vadd.f32 %v2234_v48, %v1345_v12  ;;  %v2236_v6 = vpop.f32.mrb[21].mxu0 }
 0x22b   : > { %v2568_v60 = vadd.f32 %v2567_v2, %v2519_v23  ;;  %v2521_v0 = vmul.f32 %v2460_v46, %v2376_v62  ;;  %v3038_v1 = vadd.f32 %v2236_v6, %v1347_v18  ;;  %v2238_v8 = vpop.f32.mrb[22].mxu0  ;;  %v2465_v12 = vpop.permute.xlu0 %2464 }
 0x22c   : > { %v2546_v7 = vadd.f32 %v2545_v39, %v2520_v44  ;;  %v2341_v53 = vadd.f32 %v3037_v37, %v4267_v63  ;;  %v3039_v5 = vadd.f32 %v2238_v8, %v1349_v22  ;;  %v2240_v35 = vpop.f32.mrb[23].mxu0  ;;  %v2480_v39 = vpop.permute.xlu1 %2479 }
 0x22d   : > { %v2569_v11 = vadd.f32 %v2568_v60, %v2521_v0  ;;  %v2342_v14 = vadd.f32 %v3038_v1, %v4271_v17  ;;  %v3040_v15 = vadd.f32 %v2240_v35, %v1351_v52 }
 0x22e   : > { %v2377_v21 = vmax.f32 %v2341_v53, 0.0  ;;  %v2343_v28 = vadd.f32 %v3039_v5, %v4267_v63 }
 0x22f   : > { %v1365_v20 = vpop.f32.mrb[28].mxu1  ;;  %v2378_v16 = vmax.f32 %v2342_v14, 0.0  ;;  %v2344_v58 = vadd.f32 %v3040_v15, %v4271_v17 }
 0x230   : > { %v1367_v40 = vpop.f32.mrb[29].mxu1  ;;  %v2522_v26 = vmul.f32 %v2465_v12, %v2377_v21  ;;  %v2379_v24 = vmax.f32 %v2343_v28, 0.0 }
 0x231   : > { %v1369_v18 = vpop.f32.mrb[30].mxu1  ;;  %v2523_v22 = vmul.f32 %v2465_v12, %v2378_v16  ;;  %v2380_v38 = vmax.f32 %v2344_v58, 0.0  ;;  %v2244_v57 = vpop.f32.mrb[24].mxu0 }
 0x232   : > { %v1371_v3 = vpop.f32.mrb[31].mxu1  ;;  %v2547_v30 = vadd.f32 %v2546_v7, %v2522_v26  ;;  %v2524_v49 = vmul.f32 %v2470_v10, %v2379_v24  ;;  %v3041_v52 = vadd.f32 %v2244_v57, %v1355_v32  ;;  %v2246_v9 = vpop.f32.mrb[25].mxu0 }
 0x233   : > { %v2570_v29 = vadd.f32 %v2569_v11, %v2523_v22  ;;  %v2525_v33 = vmul.f32 %v2470_v10, %v2380_v38  ;;  %v3042_v54 = vadd.f32 %v2246_v9, %v1357_v61  ;;  %v2248_v43 = vpop.f32.mrb[26].mxu0  ;;  %v2475_v32 = vpop.permute.xlu0 %2474 }
 0x234   : > { %v2548_v50 = vadd.f32 %v2547_v30, %v2524_v49  ;;  %v2345_v51 = vadd.f32 %v3041_v52, %v4267_v63  ;;  %v3043_v2 = vadd.f32 %v2248_v43, %v1359_v19  ;;  %v2250_v47 = vpop.f32.mrb[27].mxu0 }
 0x235   : > { %v2571_v34 = vadd.f32 %v2570_v29, %v2525_v33  ;;  %v2346_v55 = vadd.f32 %v3042_v54, %v4271_v17  ;;  %v3044_v45 = vadd.f32 %v2250_v47, %v1361_v4 }
 0x236   : > { %v2381_v36 = vmax.f32 %v2345_v51, 0.0  ;;  %v2347_v13 = vadd.f32 %v3043_v2, %v4267_v63 }
 0x237   : > { %v1375_v27 = vpop.f32.mrb[32].mxu1  ;;  %v2382_v56 = vmax.f32 %v2346_v55, 0.0  ;;  %v2348_v46 = vadd.f32 %v3044_v45, %v4271_v17  ;;  %v2485_v58 = vpop.permute.xlu0 %2484 }
 0x238   : > { %v1377_v25 = vpop.f32.mrb[33].mxu1  ;;  %v2526_v23 = vmul.f32 %v2475_v32, %v2381_v36  ;;  %v2383_v62 = vmax.f32 %v2347_v13, 0.0 }
 0x239   : > { %v1379_v61 = vpop.f32.mrb[34].mxu1  ;;  %v2527_v19 = vmul.f32 %v2475_v32, %v2382_v56  ;;  %v2384_v44 = vmax.f32 %v2348_v46, 0.0  ;;  %v2254_v37 = vpop.f32.mrb[28].mxu0 }
 0x23a   : > { %v1381_v48 = vpop.f32.mrb[35].mxu1  ;;  %v2549_v6 = vadd.f32 %v2548_v50, %v2526_v23  ;;  %v2528_v60 = vmul.f32 %v2480_v39, %v2383_v62  ;;  %v3045_v4 = vadd.f32 %v2254_v37, %v1365_v20  ;;  %v2256_v0 = vpop.f32.mrb[29].mxu0 }
 0x23b   : > { %v2572_v1 = vadd.f32 %v2571_v34, %v2527_v19  ;;  %v2529_v8 = vmul.f32 %v2480_v39, %v2384_v44  ;;  %v3046_v7 = vadd.f32 %v2256_v0, %v1367_v40  ;;  %v2258_v53 = vpop.f32.mrb[30].mxu0  ;;  %v2490_v40 = vpop.permute.xlu1 %2489 }
 0x23c   : > { %v2550_v5 = vadd.f32 %v2549_v6, %v2528_v60  ;;  %v2349_v35 = vadd.f32 %v3045_v4, %v4267_v63  ;;  %v3047_v11 = vadd.f32 %v2258_v53, %v1369_v18  ;;  %v2260_v14 = vpop.f32.mrb[31].mxu0  ;;  %v2495_v36 = vpop.permute.xlu0 %2494 }
 0x23d   : > { %v2573_v15 = vadd.f32 %v2572_v1, %v2529_v8  ;;  %v2350_v21 = vadd.f32 %v3046_v7, %v4271_v17  ;;  %v3048_v28 = vadd.f32 %v2260_v14, %v1371_v3 }
 0x23e   : > { %v2385_v12 = vmax.f32 %v2349_v35, 0.0  ;;  %v2351_v16 = vadd.f32 %v3047_v11, %v4267_v63 }
 0x23f   : > { %v2386_v26 = vmax.f32 %v2350_v21, 0.0  ;;  %v2352_v20 = vadd.f32 %v3048_v28, %v4271_v17 }
 0x240   : > { %v2530_v24 = vmul.f32 %v2485_v58, %v2385_v12  ;;  %v2387_v10 = vmax.f32 %v2351_v16, 0.0  ;;  %v2393_v12 = vld [vmem:[#allocation2] sm:$0x3] }
 0x241   : > { %v2531_v22 = vmul.f32 %v2485_v58, %v2386_v26  ;;  %v2388_v38 = vmax.f32 %v2352_v20, 0.0  ;;  %v2264_v57 = vpop.f32.mrb[32].mxu0  ;;  %v2629_v26 = vld [vmem:[%s4486_s4 + $0x80] sm:$0xff] (!%p2944_p1)  ;;  %v2630_v20 = vld [vmem:[%s4486_s4 + $0x88] sm:$0xff] (!%p2944_p1) }
 0x242   : > { %v2551_v30 = vadd.f32 %v2550_v5, %v2530_v24  ;;  %v2532_v18 = vmul.f32 %v2490_v40, %v2387_v10  ;;  %v3049_v49 = vadd.f32 %v2264_v57, %v1375_v27  ;;  %v2266_v52 = vpop.f32.mrb[33].mxu0  ;;  %v2613_v24 = vld [vmem:[%s4486_s4] sm:$0xff] (!%p2944_p1)  ;;  %v2983_v10 = vpack.c.bf16 (!%p2944_p1), %v2630_v20, %v2629_v26 }
 0x243   : > { %v2574_v9 = vadd.f32 %v2573_v15, %v2531_v22  ;;  %v2533_v29 = vmul.f32 %v2490_v40, %v2388_v38  ;;  %v3050_v3 = vadd.f32 %v2266_v52, %v1377_v25  ;;  %v2268_v33 = vpop.f32.mrb[34].mxu0  ;;  %v2500_v25 = vpop.permute.xlu1 %2499  ;;  %v2631_v40 = vld [vmem:[%s4486_s4 + $0x90] sm:$0xff] (!%p2944_p1)  ;;  %v2632_v22 = vld [vmem:[%s4486_s4 + $0x98] sm:$0xff] (!%p2944_p1)  ;;  %v2985_v38 = vpack.c.bf16 (!%p2944_p1), %v2614_v31, %v2613_v24  ;;  %v2634_v52 = vld [vmem:[%s4486_s4 + $0xa8] sm:$0xff] (!%p2944_p1) }
 0x244   : > { %v2552_v54 = vadd.f32 %v2551_v30, %v2532_v18  ;;  %v2353_v43 = vadd.f32 %v3049_v49, %v4267_v63  ;;  %v3051_v50 = vadd.f32 %v2268_v33, %v1379_v61  ;;  %v2270_v51 = vpop.f32.mrb[35].mxu0  ;;  %v2987_v57 = vpack.c.bf16 (!%p2944_p1), %v2632_v22, %v2631_v40  ;;  %v2615_v30 = vld [vmem:[%s4486_s4 + $0x10] sm:$0xff] (!%p2944_p1)  ;;  %v2616_v18 = vld [vmem:[%s4486_s4 + $0x18] sm:$0xff] (!%p2944_p1)  ;;  %v2633_v49 = vld [vmem:[%s4486_s4 + $0xa0] sm:$0xff] (!%p2944_p1)  ;;  %2984 = vmatprep.subr.bf16.mxu0 (!%p2944_p1), %v2983_v10 }
 0x245   : > { %v2575_v2 = vadd.f32 %v2574_v9, %v2533_v29  ;;  %v2354_v47 = vadd.f32 %v3050_v3, %v4271_v17  ;;  %v3052_v34 = vadd.f32 %v2270_v51, %v1381_v48  ;;  %2986 = vmatpush3.bf16.msra.mxu0 (!%p2944_p1), %v2985_v38  ;;  %v2989_v9 = vpack.c.bf16 (!%p2944_p1), %v2616_v18, %v2615_v30  ;;  %v2617_v3 = vld [vmem:[%s4486_s4 + $0x20] sm:$0xff] (!%p2944_p1)  ;;  %v2618_v33 = vld [vmem:[%s4486_s4 + $0x28] sm:$0xff] (!%p2944_p1) }
 0x246   : > { %v2389_v55 = vmax.f32 %v2353_v43, 0.0  ;;  %v2355_v45 = vadd.f32 %v3051_v50, %v4267_v63  ;;  %v3495_v63 = vmov 1966171168   ;;  %2988 = vmatprep.subr.bf16.mxu0 (!%p2944_p1), %v2987_v57  ;;  %v2991_v29 = vpack.c.bf16 (!%p2944_p1), %v2634_v52, %v2633_v49  ;;  %v2636_v43 = vld [vmem:[%s4486_s4 + $0xb8] sm:$0xff] (!%p2944_p1) }
 0x247   : > { %v2390_v13 = vmax.f32 %v2354_v47, 0.0  ;;  %v2356_v27 = vadd.f32 %v3052_v34, %v4271_v17  ;;  %v2588_v0 = vunpack.c.l.s4 %v3495_v63  ;;  %v2993_v50 = vpack.c.bf16 (!%p2944_p1), %v2618_v33, %v2617_v3  ;;  %v2620_v47 = vld [vmem:[%s4486_s4 + $0x38] sm:$0xff] (!%p2944_p1)  ;;  %v2637_v34 = vld [vmem:[%s4486_s4 + $0xc0] sm:$0xff] (!%p2944_p1) }
 0x248   : > { %v2534_v32 = vmul.f32 %v2495_v36, %v2389_v55  ;;  %v2391_v56 = vmax.f32 %v2355_v45, 0.0  ;;  %v2638_v55 = vld [vmem:[%s4486_s4 + $0xc8] sm:$0xff] (!%p2944_p1) }
 0x249   : > { %v2535_v46 = vmul.f32 %v2495_v36, %v2390_v13  ;;  %v2392_v23 = vmax.f32 %v2356_v27, 0.0  ;;  %v2589_v53 = vunpack.c.0.s8 %v2588_v0  ;;  %2990 = vmatpush3.bf16.msra.mxu0 (!%p2944_p1), %v2989_v9  ;;  %v2999_v27 = vpack.c.bf16 (!%p2944_p1), %v2638_v55, %v2637_v34 }
 0x24a   : > { %v2553_v62 = vadd.f32 %v2552_v54, %v2534_v32  ;;  %v2536_v39 = vmul.f32 %v2500_v25, %v2391_v56  ;;  %v2635_v54 = vld [vmem:[%s4486_s4 + $0xb0] sm:$0xff] (!%p2944_p1)  ;;  %2992 = vmatprep.subr.bf16.mxu0 (!%p2944_p1), %v2991_v29  ;;  %v2621_v32 = vld [vmem:[%s4486_s4 + $0x40] sm:$0xff] (!%p2944_p1)  ;;  %v2622_v56 = vld [vmem:[%s4486_s4 + $0x48] sm:$0xff] (!%p2944_p1) }
 0x24b   : > { %v2576_v61 = vadd.f32 %v2575_v2, %v2535_v46  ;;  %v2537_v19 = vmul.f32 %v2500_v25, %v2392_v23  ;;  %v2592_v15 = vsub.s32 %v2589_v53, %v4258_v41  ;;  %v2995_v51 = vpack.c.bf16 (!%p2944_p1), %v2636_v43, %v2635_v54  ;;  %v2619_v2 = vld [vmem:[%s4486_s4 + $0x30] sm:$0xff] (!%p2944_p1) }
 0x24c   : > { %v2554_v44 = vadd.f32 %v2553_v62, %v2536_v39  ;;  %v2997_v13 = vpack.c.bf16 (!%p2944_p1), %v2620_v47, %v2619_v2  ;;  %v2639_v25 = vld [vmem:[%s4486_s4 + $0xd0] sm:$0xff] (!%p2944_p1)  ;;  %v3001_v46 = vpack.c.bf16 (!%p2944_p1), %v2622_v56, %v2621_v32  ;;  %v2624_v39 = vld [vmem:[%s4486_s4 + $0x58] sm:$0xff] (!%p2944_p1) }
 0x24d   : > { %v2577_v37 = vadd.f32 %v2576_v61, %v2537_v19  ;;  %2994 = vmatpush3.bf16.msra.mxu0 (!%p2944_p1), %v2993_v50  ;;  %v2623_v62 = vld [vmem:[%s4486_s4 + $0x50] sm:$0xff] (!%p2944_p1)  ;;  %v2641_v61 = vld [vmem:[%s4486_s4 + $0xe0] sm:$0xff] (!%p2944_p1)  ;;  %v2642_v19 = vld [vmem:[%s4486_s4 + $0xe8] sm:$0xff] (!%p2944_p1) }
 0x24e   : > { %v2555_v6 = vrot.slane %v2554_v44, 4  ;;  %2996 = vmatprep.subr.bf16.mxu0 (!%p2944_p1), %v2995_v51 }
 0x24f   : > { %v2578_v48 = vrot.slane %v2577_v37, 4 }
 0x250   : > { %v2556_v60 = vadd.f32 %v2555_v6, %v2554_v44  ;;  %v3005_v44 = vpack.c.bf16 (!%p2944_p1), %v2624_v39, %v2623_v62  ;;  %v2625_v6 = vld [vmem:[%s4486_s4 + $0x60] sm:$0xff] (!%p2944_p1) }
 0x251   : > { %v2579_v4 = vadd.f32 %v2578_v48, %v2577_v37  ;;  %2998 = vmatpush3.bf16.msra.mxu0 (!%p2944_p1), %v2997_v13  ;;  %v3007_v37 = vpack.c.bf16 (!%p2944_p1), %v2642_v19, %v2641_v61  ;;  %v2626_v48 = vld [vmem:[%s4486_s4 + $0x68] sm:$0xff] (!%p2944_p1) }
 0x252   : > { %v2557_v1 = vrot.slane %v2556_v60, 2  ;;  %3000 = vmatprep.subr.bf16.mxu0 (!%p2944_p1), %v2999_v27  ;;  %v3009_v63 = vpack.c.bf16 (!%p2944_p1), %v2626_v48, %v2625_v6 }
 0x253   : > { %v2580_v8 = vrot.slane %v2579_v4, 2 }
 0x254   : > { %v2558_v17 = vadd.f32 %v2557_v1, %v2556_v60  ;;  %v2643_v60 = vld [vmem:[%s4486_s4 + $0xf0] sm:$0xff] (!%p2944_p1) }
 0x255   : > { %v2581_v7 = vadd.f32 %v2580_v8, %v2579_v4  ;;  %3002 = vmatpush3.bf16.msra.mxu0 (!%p2944_p1), %v3001_v46  ;;  %v2644_v4 = vld [vmem:[%s4486_s4 + $0xf8] sm:$0xff] (!%p2944_p1)  ;;  %v2627_v1 = vld [vmem:[%s4486_s4 + $0x70] sm:$0xff] (!%p2944_p1) }
 0x256   : > { %v2559_v5 = vrot.slane %v2558_v17, 1  ;;  %v3011_v0 = vpack.c.bf16 (!%p2944_p1), %v2644_v4, %v2643_v60  ;;  %v2628_v8 = vld [vmem:[%s4486_s4 + $0x78] sm:$0xff] (!%p2944_p1) }
 0x257   : > { %v2582_v35 = vrot.slane %v2581_v7, 1 }
 0x258   : > { %v2560_v11 = vadd.f32 %v2559_v5, %v2558_v17  ;;  %v3013_v17 = vpack.c.bf16 (!%p2944_p1), %v2628_v8, %v2627_v1  ;;  %v2645_v5 = vld [vmem:[%s4487_s5] sm:$0x1] (!%p2944_p1) }
 0x259   : > { %v2583_v14 = vadd.f32 %v2582_v35, %v2581_v7 }
 0x25b   : > { %v2586_v21 = vcombine.low %v2560_v11, %v2583_v14 }
 0x25d   : > { %v2593_v28 = vrot.slane %v2586_v21, %v2592_v15  ;;  %2611 = sbr.rel (%p2944_p1) target bundleno = 852 (0x354), region = 52 }
 0x25f   : > { %v2600_v16 = vrot.slane %v2593_v28, %v2592_v15 }
 0x261   : > { %v2602_v58 = vadd.f32 %v2600_v16, %v2393_v12 }
 0x263   : > { %2607 = vst.msk [vmem:[#allocation2] sm:$0x3] %vm2605_vm9, %v2602_v58 }
 0x26a   : > { %v2612_v45 = vld [vmem:[#allocation2] sm:$0x3] }
 0x26b   : > { %v2654_v36 = vrot.slane %v2612_v45, %v2317_v59  ;;  %v2640_v59 = vld [vmem:[%s4486_s4 + $0xd8] sm:$0xff]  ;;  %v2650_v7 = vrot.slane %v2612_v45, %v2313_v42 }
 0x26c   : > { %v3003_v23 = vpack.c.bf16 %v2640_v59, %v2639_v25 }
 0x26d   : > { %2721 = vmatprep.mubr.f32.mxu0 %v2654_v36 }
 0x26e   : > { %3004 = vmatprep.subr.bf16.mxu0 %v3003_v23 }
 0x26f   : > { %3006 = vmatpush3.bf16.msra.mxu0 %v3005_v44 }
 0x270   : > { %3008 = vmatprep.subr.bf16.mxu0 %v3007_v37 }
 0x273   : > { %3010 = vmatpush3.bf16.msra.mxu0 %v3009_v63 }
 0x274   : > { %3012 = vmatprep.subr.bf16.mxu0 %v3011_v0 }
 0x277   : > { %3014 = vmatpush3.bf16.msra.mxu0 %v3013_v17 }
 0x27a   : > { %2722 = vmatmul.mubr.f32.vlgmr.msra.gmra.mrb[0].mxu0 %v2650_v7 }
 0x34d   : > { %v2980_v53 = vpop.f32.mrb[0].mxu0 }
 0x34e   : > { %v2981_v35 = vpop.f32.mrb[1].mxu0 }
 0x34f   : > { %v2982_v11 = vadd.f32 %v2981_v35, %v2980_v53 }
 0x351   : > { %v2724_v14 = vadd.f32 %v2982_v11, %v2645_v5 }
 0x353   : > { %2727 = vst [vmem:[%s3613_s12] sm:$0x1] %v2724_v14 }
 0x354 PF: > { %s2945_s18 = sshll.u32 %s3479_s25, 4  ;;  %s2741_s30 = sshll.u32 %s3613_s12, 4  ;;  %s2742_s30 = int_to_ptr.vmem [resolvable:$true] %s2741_s30 }
 0x355   : > { %s4432_s29 = scalar_lea.hbm %s4488_s6, %s2945_s18  ;;  %s4492_s15 = sand.u32 1, %s3467_s22  }
 0x356   : > { %s2729_s16 = scalar_lea.sflag [#allocation4], %s4492_s15  ;;  %s3397_s11 = scalar_lea.vmem %s2742_s30, 16 }
 0x357   : > { %p3398_p2 = scmp.ne.s32.totalorder %s2742_s30, %s3397_s11  ;;  %s3496_s17 = smov [#allocation3]  }
 0x358   : > { %s3401_s14 = sshll.u32 %s3496_s17, 4  ;;  %s3402_s14 = int_to_ptr.vmem [resolvable:$false] %s3401_s14 }
 0x359   : > { %p3399_p4 = pnand %p3398_p2, %p3581_p3  ;;  %s3403_s24 = scalar_lea.vmem %s3402_s14, 32 }
 0x35a   : > { %p3404_p6 = scmp.lt.s32.totalorder %s2742_s30, %s3402_s14  ;;  %p3405_p7 = scmp.lt.s32.totalorder %s3403_s24, %s3397_s11 }
 0x35b   : > { %p3400_p5 = pneg %p3399_p4 }
 0x35c   : > { %p3406_p8 = por %p3405_p7, %p3404_p6 }
 0x35e   : > { %p3407_p10 = pnand %p3406_p8, %p3400_p5 }
 0x360   : > { %3410 = shalt.err (!%p3407_p10)
}
 0x361   : > { %s3411_s25 = scalar_lea.hbm %s4432_s29, 16  ;;  %s3415_s19 = scalar_lea.hbm %s4488_s6, 32 }
 0x362   : > { %p3412_p11 = scmp.ne.s32.totalorder %s4432_s29, %s3411_s25  ;;  %p3416_p0 = scmp.lt.u32.totalorder %s4432_s29, %s4488_s6 }
 0x363   : > { %p3417_p1 = scmp.lt.u32.totalorder %s3415_s19, %s3411_s25  ;;  %p3419_p4 = scmp.lt.u32.totalorder %s3411_s25, %s4432_s29 }
 0x364   : > { %p3413_p12 = pnand %p3412_p11, %p3581_p3 }
 0x365   : > { %p3418_p2 = por %p3417_p1, %p3416_p0 }
 0x366   : > { %p3414_p13 = pneg %p3413_p12 }
 0x367   : > { %p3420_p5 = por %p3419_p4, %p3418_p2 }
 0x369   : > { %p3421_p6 = pnand %p3420_p5, %p3414_p13 }
 0x36b   : > { %3424 = shalt.err (!%p3421_p6)
}
 0x36c   : > { %3307 = dma.vmem_to_hbm [thread:$0]  (%p3581_p3), %s2742_s30, 16, %s4432_s29, %s2729_s16  }
 0x36d PF: > { %p3313_p7 = scmp.ge.s32.totalorder %s3491_s28, 2  ;;  %s2753_s11 = sand.u32 1, %s3463_s21  }
 0x36e   : > { %s2754_s17 = scalar_lea.sflag [#allocation4], %s2753_s11 }
 0x36f   : > { %p3310_p8 = pnand %p3313_p7, %p3591_p9 }
 0x371   : > { %3458 = dma.done.wait (!%p3310_p8), %s2754_s17, 16  }
 0x372   : > { %3460 = vsyncadd (!%p3310_p8), %s2754_s17, 4294967280  ;;  %s19_s28 = sadd.s32 1, %s3491_s28   ;;  %s4493_s21 = smov %s3467_s22 }
 0x373   : > { %p16_p10 = scmp.ge.s32.totalorder %s19_s28, 6   ;;  %s4494_s22 = smov %s3471_s23 }
 0x374   : > { %s4495_s23 = smov %s3599_s13  ;;  %s4496_s24 = smov %s3483_s26 }
 0x375   : > { %s4497_s25 = smov %s3487_s27  ;;  %s4498_s26 = smov %s4501_s7 }
 0x376   : > { %s4499_s27 = smov %s4505_s8  ;;  %18 = sbr.rel (!%p16_p10) target bundleno = 5 (0x5), region = 95 }
 0x37d   :  { %2758 = vsyncpa [#allocation4], 1 }
 0x37e   :  { %2760 = vsyncpa [#allocation4 + $0x1], 1 }

</bundles_post_ra>
